<compile_context>
chip_gen: v7x
topology: tpu7x:2x2x1
jax: 0.10.0
libtpu: 0.0.40
codegen_flags: <defaults>
</compile_context>

<pallas_src>
import functools
import math

import jax
import jax.numpy as jnp
import numpy as np
from jax.experimental import pallas as pl
from jax.experimental.pallas import tpu as pltpu

_LANES = 128   # lane width of every activation / the packed output slab
_KPAD = 128    # K of all "second-stage" matmuls (their inputs are 128-lane dense)
_MAX_TB = 16   # batch-chunk size once B grows (TB*S = 128-row token matmuls);
               # raise to 32 for 256-row MXU passes on v6e/v7x if desired.

# bias-slab row indices (last two rows are 0/1 lane masks, not biases)
(_SB1, _SB2, _BQ, _BK, _BV, _BO, _PB1, _JB1, _JB2, _BOUT,
 _BR1, _BR2, _BD1, _BD2, _REGMASK, _DOMMASK) = range(16)
_NBIAS = 16


# ---------------------------------------------------------------------------
# Packed weight-slab layout (row ranges; starts 8-aligned for cheap sublane loads)
# ---------------------------------------------------------------------------
def _slab_layout(sample_feats, predicate_feats, join_feats, hid_units):
    del hid_units  # second-stage weights always use the full 128-lane K
    entries = [
        ("sw1", sample_feats), ("sw2", _KPAD),
        ("wq", predicate_feats), ("wk", predicate_feats), ("wv", predicate_feats),
        ("wo", _KPAD), ("pw1", _KPAD),
        ("jw1", join_feats), ("jw2", _KPAD),
        ("wos", _KPAD), ("wop", _KPAD), ("woj", _KPAD),
        ("wr1", _KPAD), ("wr2", _KPAD), ("wd1", _KPAD), ("wd2", _KPAD),
    ]
    offs, r = {}, 0
    for name, rows in entries:
        offs[name] = (r, r + rows)
        r += -(-rows // 8) * 8
    return offs, r


# ---------------------------------------------------------------------------
# One-time parameter packing (hoisted out of the per-call path)
# ---------------------------------------------------------------------------
def prepare_params(params):
    f32 = jnp.float32
    sw1, sb1, sw2, sb2 = params["sample"]
    wq, bq, wk, bk, wv, bv, wo, bo, pw1, pb1 = params["predicate"]
    jw1, jb1, jw2, jb2 = params["join"]
    wout, bout, wr1, br1, wr2, br2, wd1, bd1, wd2, bd2 = params["head"]

    Fs, H = sw1.shape
    Fp = wq.shape[0]
    Fj = jw1.shape[0]
    assert H + 3 <= _LANES and wd1.shape[1] <= _LANES
    assert max(Fs, Fp, Fj) <= _LANES

    offs, total_rows = _slab_layout(Fs, Fp, Fj, H)
    scale = 1.0 / math.sqrt(Fp)                 # fold attention 1/sqrt(E) into Q
    wos, wop, woj = wout[0:H], wout[H:2 * H], wout[2 * H:3 * H]

    w_slab = jnp.zeros((total_rows, _LANES), f32)

    def put(name, w, col=0):
        nonlocal w_slab
        r0, _ = offs[name]
        w_slab = w_slab.at[r0:r0 + w.shape[0], col:col + w.shape[1]].set(w.astype(f32))

    put("sw1", sw1); put("sw2", sw2)
    put("wq", wq * scale); put("wk", wk); put("wv", wv)
    put("wo", wo); put("pw1", pw1)
    put("jw1", jw1); put("jw2", jw2)
    put("wos", wos); put("wop", wop); put("woj", woj)
    put("wr1", wr1); put("wr2", wr2, col=H)          # regression output -> lane H
    put("wd1", wd1); put("wd2", wd2, col=H + 1)      # domain logits -> lanes H+1,H+2

    b_slab = jnp.zeros((_NBIAS, _LANES), f32)

    def putb(row, b, col=0):
        nonlocal b_slab
        b = jnp.reshape(b, (-1,)).astype(f32)
        b_slab = b_slab.at[row, col:col + b.shape[0]].set(b)

    putb(_SB1, sb1); putb(_SB2, sb2)
    putb(_BQ, bq * scale); putb(_BK, bk); putb(_BV, bv); putb(_BO, bo)
    putb(_PB1, pb1); putb(_JB1, jb1); putb(_JB2, jb2); putb(_BOUT, bout)
    putb(_BR1, br1); putb(_BR2, br2, col=H)
    putb(_BD1, bd1); putb(_BD2, bd2, col=H + 1)
    b_slab = b_slab.at[_REGMASK, H].set(1.0)                 # sigmoid lane mask
    b_slab = b_slab.at[_DOMMASK, H + 1:H + 3].set(1.0)       # log-softmax lane mask

    return {"w": w_slab, "b": b_slab}


# ---------------------------------------------------------------------------
# Fused kernel (closure over static slab row offsets)
# ---------------------------------------------------------------------------
def _make_kernel(offs):
    def kernel(xs_ref, xp_ref, xj_ref, pms_ref, pmp_ref, pmj_ref,
               am_ref, w_ref, b_ref, o_ref):
        f32 = jnp.float32
        relu = lambda v: jnp.maximum(v, 0.0)
        dot = lambda a, b: jnp.dot(a, b, preferred_element_type=f32)
        W = lambda n: w_ref[offs[n][0]:offs[n][1], :]        # static (free) ref views
        bias = lambda i: b_ref[i:i + 1, :]

        # ---- sample branch: MLP on (TB*Ss, Fs) tokens, then masked mean pool ----
        hs = relu(dot(xs_ref[...], W("sw1")) + bias(_SB1))
        hs = relu(dot(hs, W("sw2")) + bias(_SB2))
        hs = dot(pms_ref[...], hs)                           # (TB,128); lanes [H:)=0

        # ---- predicate branch: single-head self-attention within each batch ----
        xp = xp_ref[...]
        q = dot(xp, W("wq")) + bias(_BQ)                     # 1/sqrt(E) pre-folded
        k = dot(xp, W("wk")) + bias(_BK)
        v = dot(xp, W("wv")) + bias(_BV)
        scores = dot(q, k.T)                                 # (TB*Sp, TB*Sp)
        keep = am_ref[...] > 0.0                             # block-diagonal keep mask
        m = jnp.max(jnp.where(keep, scores, -jnp.inf), axis=-1, keepdims=True)
        p = jnp.where(keep, jnp.exp(scores - m), 0.0)        # mask after row-max
        p = p / jnp.sum(p, axis=-1, keepdims=True)           # exact divide
        att = dot(dot(p, v), W("wo")) + bias(_BO)
        hp = relu(dot(att, W("pw1")) + bias(_PB1))
        hp = dot(pmp_ref[...], hp)

        # ---- join branch ----
        hj = relu(dot(xj_ref[...], W("jw1")) + bias(_JB1))
        hj = relu(dot(hj, W("jw2")) + bias(_JB2))
        hj = dot(pmj_ref[...], hj)

        # ---- head: relu(cat(hs,hp,hj) @ Wout + bout) as three matmuls ----
        hid = relu(dot(hs, W("wos")) + dot(hp, W("wop")) + dot(hj, W("woj"))
                   + bias(_BOUT))                            # (TB,128); lanes [H:)==0

        # regression: Linear->ReLU->Linear->Sigmoid routed to lane H; the other
        # lanes evaluate sigmoid(0)=0.5 and are zeroed by the reg lane mask below.
        r1 = relu(dot(hid, W("wr1")) + bias(_BR1))
        sig = 1.0 / (1.0 + jnp.exp(-(dot(r1, W("wr2")) + bias(_BR2))))

        # domain classifier (GRL is identity in forward): logits at lanes H+1,H+2;
        # masked log-softmax so pad lanes never enter the logsumexp.
        d1 = relu(dot(hid, W("wd1")) + bias(_BD1))
        logits = dot(d1, W("wd2")) + bias(_BD2)
        dmask = bias(_DOMMASK)
        keep_d = dmask > 0.0
        mz = jnp.max(jnp.where(keep_d, logits, -jnp.inf), axis=-1, keepdims=True)
        z = logits - mz
        lse = jnp.log(jnp.sum(jnp.where(keep_d, jnp.exp(z), 0.0),
                              axis=-1, keepdims=True))
        logp = z - lse

        # single unmasked lane-dense store: [hid | sigmoid | log-probs | zeros]
        o_ref[...] = hid + sig * bias(_REGMASK) + logp * dmask

    return kernel


# ---------------------------------------------------------------------------
# Forward wrapper
# ---------------------------------------------------------------------------
@functools.partial(jax.jit, static_argnames=("hid_units",))
def ahce_forward(prepped, samples, predicates, joins,
                 sample_mask, predicate_mask, join_mask,
                 grl_lambda=1.0, *, hid_units):
    del grl_lambda  # GradientReversalFn is identity in the forward pass
    f32 = jnp.float32
    B, Ss, Fs = samples.shape
    _, Sp, Fp = predicates.shape
    _, Sj, Fj = joins.shape
    H = hid_units
    offs, _ = _slab_layout(Fs, Fp, Fj, H)

    # batch chunking: one grid step per TB batch elements; "parallel" -> megacore.
    if B <= _MAX_TB:
        TB, C = B, 1
    else:
        TB = _MAX_TB
        C = pl.cdiv(B, TB)
    Bp = C * TB

    def pad_b(x):
        if x.shape[0] == Bp:
            return x
        pad = jnp.zeros((Bp - x.shape[0],) + x.shape[1:], x.dtype)
        return jnp.concatenate([x, pad], axis=0)

    def pool_mat(mask, S):
        # (B,S,1) mask -> (Bp, TB*S) block-diagonal, mask-normalized pooling matrix
        m = mask.reshape(B, S).astype(f32)
        w = m / jnp.sum(m, axis=1, keepdims=True)            # exact mean weights
        w = pad_b(w).reshape(C, TB, S)                        # pad rows pool to 0
        eye = jnp.eye(TB, dtype=f32)
        return (eye[None, :, :, None] * w[:, :, None, :]).reshape(Bp, TB * S)

    xs = pad_b(samples.astype(f32)).reshape(Bp * Ss, Fs)
    xp = pad_b(predicates.astype(f32)).reshape(Bp * Sp, Fp)
    xj = pad_b(joins.astype(f32)).reshape(Bp * Sj, Fj)
    pms = pool_mat(sample_mask, Ss)
    pmp = pool_mat(predicate_mask, Sp)
    pmj = pool_mat(join_mask, Sj)

    # block-diagonal attention keep-mask within one chunk (shape-only constant)
    bid = jnp.arange(TB * Sp, dtype=jnp.int32) // Sp
    amask = (bid[:, None] == bid[None, :]).astype(f32)

    # Blocked BlockSpecs default to VMEM residency on TPU; every operand is specced.
    packed = pl.pallas_call(
        _make_kernel(offs),
        out_shape=jax.ShapeDtypeStruct((Bp, _LANES), f32),
        grid=(C,),
        in_specs=[
            pl.BlockSpec((TB * Ss, Fs), lambda c: (c, 0)),
            pl.BlockSpec((TB * Sp, Fp), lambda c: (c, 0)),
            pl.BlockSpec((TB * Sj, Fj), lambda c: (c, 0)),
            pl.BlockSpec((TB, TB * Ss), lambda c: (c, 0)),
            pl.BlockSpec((TB, TB * Sp), lambda c: (c, 0)),
            pl.BlockSpec((TB, TB * Sj), lambda c: (c, 0)),
            pl.BlockSpec((TB * Sp, TB * Sp), lambda c: (0, 0)),  # shared by chunks
            pl.BlockSpec(prepped["w"].shape, lambda c: (0, 0)),  # weight slab
            pl.BlockSpec(prepped["b"].shape, lambda c: (0, 0)),  # bias/mask slab
        ],
        out_specs=pl.BlockSpec((TB, _LANES), lambda c: (c, 0)),
        compiler_params=pltpu.CompilerParams(dimension_semantics=("parallel",)),
    )(xs, xp, xj, pms, pmp, pmj, amask, prepped["w"], prepped["b"])

    hid = packed[:B, :H]
    out = packed[:B, H:H + 1]
    domain_pred = packed[:B, H + 1:H + 3]
    return hid, out, domain_pred


# ---------------------------------------------------------------------------
# Deterministic parameter construction (mirrors the PyTorch __init__ shapes)
# ---------------------------------------------------------------------------
def _init_linear(key, fan_in, fan_out):
    kw, kb = jax.random.split(key)
    bound = 1.0 / math.sqrt(fan_in)
    w = jax.random.uniform(kw, (fan_in, fan_out), jnp.float32, -bound, bound)
    b = jax.random.uniform(kb, (1, fan_out), jnp.float32, -bound, bound)
    return w, b


def make_params(key, sample_feats, predicate_feats, join_feats, hid_units):
    ks = jax.random.split(key, 14)
    sw1, sb1 = _init_linear(ks[0], sample_feats, hid_units)
    sw2, sb2 = _init_linear(ks[1], hid_units, hid_units)
    wq, bq = _init_linear(ks[2], predicate_feats, predicate_feats)
    wk, bk = _init_linear(ks[3], predicate_feats, predicate_feats)
    wv, bv = _init_linear(ks[4], predicate_feats, predicate_feats)
    wo, bo = _init_linear(ks[5], predicate_feats, predicate_feats)
    pw1, pb1 = _init_linear(ks[6], predicate_feats, hid_units)
    jw1, jb1 = _init_linear(ks[7], join_feats, hid_units)
    jw2, jb2 = _init_linear(ks[8], hid_units, hid_units)
    wout, bout = _init_linear(ks[9], hid_units * 3, hid_units)
    wr1, br1 = _init_linear(ks[10], hid_units, hid_units)
    wr2, br2 = _init_linear(ks[11], hid_units, 1)
    wd1, bd1 = _init_linear(ks[12], hid_units, 100)
    wd2, bd2 = _init_linear(ks[13], 100, 2)
    return {
        "sample": (sw1, sb1, sw2, sb2),
        "predicate": (wq, bq, wk, bk, wv, bv, wo, bo, pw1, pb1),
        "join": (jw1, jb1, jw2, jb2),
        "head": (wout, bout, wr1, br1, wr2, br2, wd1, bd1, wd2, bd2),
    }


# ---------------------------------------------------------------------------
# Pure-JAX reference (numerical sanity check)
# ---------------------------------------------------------------------------
def ahce_reference(params, samples, predicates, joins,
                   sample_mask, predicate_mask, join_mask):
    relu = lambda x: jnp.maximum(x, 0.0)

    sw1, sb1, sw2, sb2 = params["sample"]
    hs = relu(relu(samples @ sw1 + sb1) @ sw2 + sb2) * sample_mask
    hs = hs.sum(1) / sample_mask.sum(1)

    wq, bq, wk, bk, wv, bv, wo, bo, pw1, pb1 = params["predicate"]
    E = predicates.shape[-1]
    q = predicates @ wq + bq
    k = predicates @ wk + bk
    v = predicates @ wv + bv
    scores = jnp.einsum("bse,bte->bst", q, k) / math.sqrt(E)
    p = jax.nn.softmax(scores, axis=-1)
    att = jnp.einsum("bst,bte->bse", p, v) @ wo + bo
    hp = relu(att @ pw1 + pb1) * predicate_mask
    hp = hp.sum(1) / predicate_mask.sum(1)

    jw1, jb1, jw2, jb2 = params["join"]
    hj = relu(relu(joins @ jw1 + jb1) @ jw2 + jb2) * join_mask
    hj = hj.sum(1) / join_mask.sum(1)

    wout, bout, wr1, br1, wr2, br2, wd1, bd1, wd2, bd2 = params["head"]
    hid = relu(jnp.concatenate([hs, hp, hj], axis=1) @ wout + bout)
    out = jax.nn.sigmoid(relu(hid @ wr1 + br1) @ wr2 + br2)
    dom = jax.nn.log_softmax(relu(hid @ wd1 + bd1) @ wd2 + bd2, axis=1)
    return hid, out, dom


# ---------------------------------------------------------------------------
# Main
# ---------------------------------------------------------------------------
if __name__ == "__main__":
    SAMPLE_FEATS, PREDICATE_FEATS, JOIN_FEATS, HID = 12, 16, 10, 32
    S_SAMP, S_PRED, S_JOIN = 8, 8, 8

    root = jax.random.PRNGKey(0)
    kp, kd = jax.random.split(root)
    params = make_params(kp, SAMPLE_FEATS, PREDICATE_FEATS, JOIN_FEATS, HID)
    prepped = prepare_params(params)          # hoisted: runs once, not per forward

    def run_case(key, B):
        kx1, kx2, kx3, km1, km2, km3 = jax.random.split(key, 6)
        samples = jax.random.normal(kx1, (B, S_SAMP, SAMPLE_FEATS), jnp.float32)
        predicates = jax.random.normal(kx2, (B, S_PRED, PREDICATE_FEATS), jnp.float32)
        joins = jax.random.normal(kx3, (B, S_JOIN, JOIN_FEATS), jnp.float32)

        def make_mask(k, s):
            m = jax.random.bernoulli(k, 0.7, (B, s, 1)).astype(jnp.float32)
            return m.at[:, 0, :].set(1.0)     # at least one valid position per row

        sm = make_mask(km1, S_SAMP)
        pm = make_mask(km2, S_PRED)
        jm = make_mask(km3, S_JOIN)

        hid, out, dom = jax.block_until_ready(
            ahce_forward(prepped, samples, predicates, joins, sm, pm, jm, 1.0,
                         hid_units=HID))
        hid_r, out_r, dom_r = jax.block_until_ready(
            ahce_reference(params, samples, predicates, joins, sm, pm, jm))

        assert hid.shape == (B, HID) and out.shape == (B, 1) and dom.shape == (B, 2)
        np.testing.assert_allclose(np.asarray(hid), np.asarray(hid_r), rtol=1e-2, atol=1e-2)
        np.testing.assert_allclose(np.asarray(out), np.asarray(out_r), rtol=1e-2, atol=1e-2)
        np.testing.assert_allclose(np.asarray(dom), np.asarray(dom_r), rtol=1e-2, atol=1e-2)

    k_small, k_big = jax.random.split(kd)
    run_case(k_small, 2)    # required small case: single chunk, grid=(1,)
    run_case(k_big, 40)     # batched path: TB=16, 3 chunks, batch padded to 48
    print("KERNEL_OK")
</pallas_src>

<mosaic_0001>
module attributes {stable_mosaic.version = 11 : i64} {
  func.func @kernel(%arg0: i32, %arg1: memref<16x12xf32, #tpu.memory_space<vmem>>, %arg2: memref<16x16xf32, #tpu.memory_space<vmem>>, %arg3: memref<16x10xf32, #tpu.memory_space<vmem>>, %arg4: memref<2x16xf32, #tpu.memory_space<vmem>>, %arg5: memref<2x16xf32, #tpu.memory_space<vmem>>, %arg6: memref<2x16xf32, #tpu.memory_space<vmem>>, %arg7: memref<16x16xf32, #tpu.memory_space<vmem>>, %arg8: memref<1488x128xf32, #tpu.memory_space<vmem>>, %arg9: memref<16x128xf32, #tpu.memory_space<vmem>>, %arg10: memref<2x128xf32, #tpu.memory_space<vmem>>) attributes {dimension_semantics = [#tpu.dimension_semantics<parallel>], iteration_bounds = array<i64: 1>, scalar_prefetch = 0 : i64, scratch_operands = 0 : i64, tpu.core_type = #tpu.core_type<tc>, window_params = [{transform_indices = @transform_0, window_bounds = array<i64: 16, 12>}, {transform_indices = @transform_1, window_bounds = array<i64: 16, 16>}, {transform_indices = @transform_2, window_bounds = array<i64: 16, 10>}, {transform_indices = @transform_3, window_bounds = array<i64: 2, 16>}, {transform_indices = @transform_4, window_bounds = array<i64: 2, 16>}, {transform_indices = @transform_5, window_bounds = array<i64: 2, 16>}, {pipeline_mode = #tpu.pipeline_mode<synchronous>, transform_indices = @transform_6, window_bounds = array<i64: 16, 16>}, {pipeline_mode = #tpu.pipeline_mode<synchronous>, transform_indices = @transform_7, window_bounds = array<i64: 1488, 128>}, {pipeline_mode = #tpu.pipeline_mode<synchronous>, transform_indices = @transform_8, window_bounds = array<i64: 16, 128>}, {transform_indices = @transform_9, window_bounds = array<i64: 2, 128>}]} {
    %c0 = arith.constant 0 : index
    %c0_0 = arith.constant 0 : index
    %0 = vector.load %arg1[%c0, %c0_0] : memref<16x12xf32, #tpu.memory_space<vmem>>, vector<16x12xf32>
    %c0_1 = arith.constant 0 : index
    %c0_2 = arith.constant 0 : index
    %1 = vector.load %arg8[%c0_1, %c0_2] : memref<1488x128xf32, #tpu.memory_space<vmem>>, vector<12x128xf32>
    %cst = arith.constant dense<0.000000e+00> : vector<16x128xf32>
    %2 = tpu.matmul %0, %1, %cst {dimension_numbers = #tpu.dot_dimension_numbers<[1], [0], [0], [1], [0, 0, 1, 1], [], []>} : vector<16x12xf32>, vector<12x128xf32>, vector<16x128xf32> -> vector<16x128xf32>
    %c0_3 = arith.constant 0 : index
    %c0_4 = arith.constant 0 : index
    %3 = vector.load %arg9[%c0_3, %c0_4] : memref<16x128xf32, #tpu.memory_space<vmem>>, vector<1x128xf32>
    %4 = vector.broadcast %3 : vector<1x128xf32> to vector<16x128xf32>
    %5 = arith.addf %2, %4 : vector<16x128xf32>
    %cst_5 = arith.constant 0.000000e+00 : f32
    %6 = vector.broadcast %cst_5 : f32 to vector<16x128xf32>
    %7 = arith.maximumf %5, %6 : vector<16x128xf32>
    %c16 = arith.constant 16 : index
    %c0_6 = arith.constant 0 : index
    %8 = vector.load %arg8[%c16, %c0_6] : memref<1488x128xf32, #tpu.memory_space<vmem>>, vector<128x128xf32>
    %cst_7 = arith.constant dense<0.000000e+00> : vector<16x128xf32>
    %9 = tpu.matmul %7, %8, %cst_7 {dimension_numbers = #tpu.dot_dimension_numbers<[1], [0], [0], [1], [0, 0, 1, 1], [], []>} : vector<16x128xf32>, vector<128x128xf32>, vector<16x128xf32> -> vector<16x128xf32>
    %c1 = arith.constant 1 : index
    %c0_8 = arith.constant 0 : index
    %10 = vector.load %arg9[%c1, %c0_8] : memref<16x128xf32, #tpu.memory_space<vmem>>, vector<1x128xf32>
    %11 = vector.broadcast %10 : vector<1x128xf32> to vector<16x128xf32>
    %12 = arith.addf %9, %11 : vector<16x128xf32>
    %cst_9 = arith.constant 0.000000e+00 : f32
    %13 = vector.broadcast %cst_9 : f32 to vector<16x128xf32>
    %14 = arith.maximumf %12, %13 : vector<16x128xf32>
    %c0_10 = arith.constant 0 : index
    %c0_11 = arith.constant 0 : index
    %15 = vector.load %arg4[%c0_10, %c0_11] : memref<2x16xf32, #tpu.memory_space<vmem>>, vector<2x16xf32>
    %cst_12 = arith.constant dense<0.000000e+00> : vector<2x128xf32>
    %16 = tpu.matmul %15, %14, %cst_12 {dimension_numbers = #tpu.dot_dimension_numbers<[1], [0], [0], [1], [0, 0, 1, 1], [], []>} : vector<2x16xf32>, vector<16x128xf32>, vector<2x128xf32> -> vector<2x128xf32>
    %c0_13 = arith.constant 0 : index
    %c0_14 = arith.constant 0 : index
    %17 = vector.load %arg2[%c0_13, %c0_14] : memref<16x16xf32, #tpu.memory_space<vmem>>, vector<16x16xf32>
    %c144 = arith.constant 144 : index
    %c0_15 = arith.constant 0 : index
    %18 = vector.load %arg8[%c144, %c0_15] : memref<1488x128xf32, #tpu.memory_space<vmem>>, vector<16x128xf32>
    %cst_16 = arith.constant dense<0.000000e+00> : vector<16x128xf32>
    %19 = tpu.matmul %17, %18, %cst_16 {dimension_numbers = #tpu.dot_dimension_numbers<[1], [0], [0], [1], [0, 0, 1, 1], [], []>} : vector<16x16xf32>, vector<16x128xf32>, vector<16x128xf32> -> vector<16x128xf32>
    %c2 = arith.constant 2 : index
    %c0_17 = arith.constant 0 : index
    %20 = vector.load %arg9[%c2, %c0_17] : memref<16x128xf32, #tpu.memory_space<vmem>>, vector<1x128xf32>
    %21 = vector.broadcast %20 : vector<1x128xf32> to vector<16x128xf32>
    %22 = arith.addf %19, %21 : vector<16x128xf32>
    %c160 = arith.constant 160 : index
    %c0_18 = arith.constant 0 : index
    %23 = vector.load %arg8[%c160, %c0_18] : memref<1488x128xf32, #tpu.memory_space<vmem>>, vector<16x128xf32>
    %cst_19 = arith.constant dense<0.000000e+00> : vector<16x128xf32>
    %24 = tpu.matmul %17, %23, %cst_19 {dimension_numbers = #tpu.dot_dimension_numbers<[1], [0], [0], [1], [0, 0, 1, 1], [], []>} : vector<16x16xf32>, vector<16x128xf32>, vector<16x128xf32> -> vector<16x128xf32>
    %c3 = arith.constant 3 : index
    %c0_20 = arith.constant 0 : index
    %25 = vector.load %arg9[%c3, %c0_20] : memref<16x128xf32, #tpu.memory_space<vmem>>, vector<1x128xf32>
    %26 = vector.broadcast %25 : vector<1x128xf32> to vector<16x128xf32>
    %27 = arith.addf %24, %26 : vector<16x128xf32>
    %c176 = arith.constant 176 : index
    %c0_21 = arith.constant 0 : index
    %28 = vector.load %arg8[%c176, %c0_21] : memref<1488x128xf32, #tpu.memory_space<vmem>>, vector<16x128xf32>
    %cst_22 = arith.constant dense<0.000000e+00> : vector<16x128xf32>
    %29 = tpu.matmul %17, %28, %cst_22 {dimension_numbers = #tpu.dot_dimension_numbers<[1], [0], [0], [1], [0, 0, 1, 1], [], []>} : vector<16x16xf32>, vector<16x128xf32>, vector<16x128xf32> -> vector<16x128xf32>
    %c4 = arith.constant 4 : index
    %c0_23 = arith.constant 0 : index
    %30 = vector.load %arg9[%c4, %c0_23] : memref<16x128xf32, #tpu.memory_space<vmem>>, vector<1x128xf32>
    %31 = vector.broadcast %30 : vector<1x128xf32> to vector<16x128xf32>
    %32 = arith.addf %29, %31 : vector<16x128xf32>
    %33 = tpu.transpose %27, [1, 0] : vector<16x128xf32> -> vector<128x16xf32>
    %cst_24 = arith.constant dense<0.000000e+00> : vector<16x16xf32>
    %34 = tpu.matmul %22, %33, %cst_24 {dimension_numbers = #tpu.dot_dimension_numbers<[1], [0], [0], [1], [0, 0, 1, 1], [], []>} : vector<16x128xf32>, vector<128x16xf32>, vector<16x16xf32> -> vector<16x16xf32>
    %c0_25 = arith.constant 0 : index
    %c0_26 = arith.constant 0 : index
    %35 = vector.load %arg7[%c0_25, %c0_26] : memref<16x16xf32, #tpu.memory_space<vmem>>, vector<16x16xf32>
    %cst_27 = arith.constant 0.000000e+00 : f32
    %36 = vector.broadcast %cst_27 : f32 to vector<16x16xf32>
    %37 = arith.cmpf ogt, %35, %36 : vector<16x16xf32>
    %cst_28 = arith.constant 0xFF800000 : f32
    %38 = vector.broadcast %cst_28 : f32 to vector<16x16xf32>
    %39 = arith.select %37, %34, %38 : vector<16x16xi1>, vector<16x16xf32>
    %cst_29 = arith.constant dense<0xFF800000> : vector<16xf32>
    %40 = vector.multi_reduction <maximumf>, %39, %cst_29 [1] : vector<16x16xf32> to vector<16xf32>
    %41 = vector.shape_cast %40 : vector<16xf32> to vector<16x1xf32>
    %42 = vector.broadcast %41 : vector<16x1xf32> to vector<16x16xf32>
    %43 = arith.subf %34, %42 : vector<16x16xf32>
    %44 = math.exp %43 : vector<16x16xf32>
    %cst_30 = arith.constant 0.000000e+00 : f32
    %45 = vector.broadcast %cst_30 : f32 to vector<16x16xf32>
    %46 = arith.select %37, %44, %45 : vector<16x16xi1>, vector<16x16xf32>
    %cst_31 = arith.constant dense<0.000000e+00> : vector<16xf32>
    %47 = vector.multi_reduction <add>, %46, %cst_31 [1] : vector<16x16xf32> to vector<16xf32>
    %48 = vector.shape_cast %47 : vector<16xf32> to vector<16x1xf32>
    %49 = vector.broadcast %48 : vector<16x1xf32> to vector<16x16xf32>
    %50 = arith.divf %46, %49 : vector<16x16xf32>
    %cst_32 = arith.constant dense<0.000000e+00> : vector<16x128xf32>
    %51 = tpu.matmul %50, %32, %cst_32 {dimension_numbers = #tpu.dot_dimension_numbers<[1], [0], [0], [1], [0, 0, 1, 1], [], []>} : vector<16x16xf32>, vector<16x128xf32>, vector<16x128xf32> -> vector<16x128xf32>
    %c192 = arith.constant 192 : index
    %c0_33 = arith.constant 0 : index
    %52 = vector.load %arg8[%c192, %c0_33] : memref<1488x128xf32, #tpu.memory_space<vmem>>, vector<128x128xf32>
    %cst_34 = arith.constant dense<0.000000e+00> : vector<16x128xf32>
    %53 = tpu.matmul %51, %52, %cst_34 {dimension_numbers = #tpu.dot_dimension_numbers<[1], [0], [0], [1], [0, 0, 1, 1], [], []>} : vector<16x128xf32>, vector<128x128xf32>, vector<16x128xf32> -> vector<16x128xf32>
    %c5 = arith.constant 5 : index
    %c0_35 = arith.constant 0 : index
    %54 = vector.load %arg9[%c5, %c0_35] : memref<16x128xf32, #tpu.memory_space<vmem>>, vector<1x128xf32>
    %55 = vector.broadcast %54 : vector<1x128xf32> to vector<16x128xf32>
    %56 = arith.addf %53, %55 : vector<16x128xf32>
    %c320 = arith.constant 320 : index
    %c0_36 = arith.constant 0 : index
    %57 = vector.load %arg8[%c320, %c0_36] : memref<1488x128xf32, #tpu.memory_space<vmem>>, vector<128x128xf32>
    %cst_37 = arith.constant dense<0.000000e+00> : vector<16x128xf32>
    %58 = tpu.matmul %56, %57, %cst_37 {dimension_numbers = #tpu.dot_dimension_numbers<[1], [0], [0], [1], [0, 0, 1, 1], [], []>} : vector<16x128xf32>, vector<128x128xf32>, vector<16x128xf32> -> vector<16x128xf32>
    %c6 = arith.constant 6 : index
    %c0_38 = arith.constant 0 : index
    %59 = vector.load %arg9[%c6, %c0_38] : memref<16x128xf32, #tpu.memory_space<vmem>>, vector<1x128xf32>
    %60 = vector.broadcast %59 : vector<1x128xf32> to vector<16x128xf32>
    %61 = arith.addf %58, %60 : vector<16x128xf32>
    %cst_39 = arith.constant 0.000000e+00 : f32
    %62 = vector.broadcast %cst_39 : f32 to vector<16x128xf32>
    %63 = arith.maximumf %61, %62 : vector<16x128xf32>
    %c0_40 = arith.constant 0 : index
    %c0_41 = arith.constant 0 : index
    %64 = vector.load %arg5[%c0_40, %c0_41] : memref<2x16xf32, #tpu.memory_space<vmem>>, vector<2x16xf32>
    %cst_42 = arith.constant dense<0.000000e+00> : vector<2x128xf32>
    %65 = tpu.matmul %64, %63, %cst_42 {dimension_numbers = #tpu.dot_dimension_numbers<[1], [0], [0], [1], [0, 0, 1, 1], [], []>} : vector<2x16xf32>, vector<16x128xf32>, vector<2x128xf32> -> vector<2x128xf32>
    %c0_43 = arith.constant 0 : index
    %c0_44 = arith.constant 0 : index
    %66 = vector.load %arg3[%c0_43, %c0_44] : memref<16x10xf32, #tpu.memory_space<vmem>>, vector<16x10xf32>
    %c448 = arith.constant 448 : index
    %c0_45 = arith.constant 0 : index
    %67 = vector.load %arg8[%c448, %c0_45] : memref<1488x128xf32, #tpu.memory_space<vmem>>, vector<10x128xf32>
    %cst_46 = arith.constant dense<0.000000e+00> : vector<16x128xf32>
    %68 = tpu.matmul %66, %67, %cst_46 {dimension_numbers = #tpu.dot_dimension_numbers<[1], [0], [0], [1], [0, 0, 1, 1], [], []>} : vector<16x10xf32>, vector<10x128xf32>, vector<16x128xf32> -> vector<16x128xf32>
    %c7 = arith.constant 7 : index
    %c0_47 = arith.constant 0 : index
    %69 = vector.load %arg9[%c7, %c0_47] : memref<16x128xf32, #tpu.memory_space<vmem>>, vector<1x128xf32>
    %70 = vector.broadcast %69 : vector<1x128xf32> to vector<16x128xf32>
    %71 = arith.addf %68, %70 : vector<16x128xf32>
    %cst_48 = arith.constant 0.000000e+00 : f32
    %72 = vector.broadcast %cst_48 : f32 to vector<16x128xf32>
    %73 = arith.maximumf %71, %72 : vector<16x128xf32>
    %c464 = arith.constant 464 : index
    %c0_49 = arith.constant 0 : index
    %74 = vector.load %arg8[%c464, %c0_49] : memref<1488x128xf32, #tpu.memory_space<vmem>>, vector<128x128xf32>
    %cst_50 = arith.constant dense<0.000000e+00> : vector<16x128xf32>
    %75 = tpu.matmul %73, %74, %cst_50 {dimension_numbers = #tpu.dot_dimension_numbers<[1], [0], [0], [1], [0, 0, 1, 1], [], []>} : vector<16x128xf32>, vector<128x128xf32>, vector<16x128xf32> -> vector<16x128xf32>
    %c8 = arith.constant 8 : index
    %c0_51 = arith.constant 0 : index
    %76 = vector.load %arg9[%c8, %c0_51] : memref<16x128xf32, #tpu.memory_space<vmem>>, vector<1x128xf32>
    %77 = vector.broadcast %76 : vector<1x128xf32> to vector<16x128xf32>
    %78 = arith.addf %75, %77 : vector<16x128xf32>
    %cst_52 = arith.constant 0.000000e+00 : f32
    %79 = vector.broadcast %cst_52 : f32 to vector<16x128xf32>
    %80 = arith.maximumf %78, %79 : vector<16x128xf32>
    %c0_53 = arith.constant 0 : index
    %c0_54 = arith.constant 0 : index
    %81 = vector.load %arg6[%c0_53, %c0_54] : memref<2x16xf32, #tpu.memory_space<vmem>>, vector<2x16xf32>
    %cst_55 = arith.constant dense<0.000000e+00> : vector<2x128xf32>
    %82 = tpu.matmul %81, %80, %cst_55 {dimension_numbers = #tpu.dot_dimension_numbers<[1], [0], [0], [1], [0, 0, 1, 1], [], []>} : vector<2x16xf32>, vector<16x128xf32>, vector<2x128xf32> -> vector<2x128xf32>
    %c592 = arith.constant 592 : index
    %c0_56 = arith.constant 0 : index
    %83 = vector.load %arg8[%c592, %c0_56] : memref<1488x128xf32, #tpu.memory_space<vmem>>, vector<128x128xf32>
    %cst_57 = arith.constant dense<0.000000e+00> : vector<2x128xf32>
    %84 = tpu.matmul %16, %83, %cst_57 {dimension_numbers = #tpu.dot_dimension_numbers<[1], [0], [0], [1], [0, 0, 1, 1], [], []>} : vector<2x128xf32>, vector<128x128xf32>, vector<2x128xf32> -> vector<2x128xf32>
    %c720 = arith.constant 720 : index
    %c0_58 = arith.constant 0 : index
    %85 = vector.load %arg8[%c720, %c0_58] : memref<1488x128xf32, #tpu.memory_space<vmem>>, vector<128x128xf32>
    %cst_59 = arith.constant dense<0.000000e+00> : vector<2x128xf32>
    %86 = tpu.matmul %65, %85, %cst_59 {dimension_numbers = #tpu.dot_dimension_numbers<[1], [0], [0], [1], [0, 0, 1, 1], [], []>} : vector<2x128xf32>, vector<128x128xf32>, vector<2x128xf32> -> vector<2x128xf32>
    %87 = arith.addf %84, %86 : vector<2x128xf32>
    %c848 = arith.constant 848 : index
    %c0_60 = arith.constant 0 : index
    %88 = vector.load %arg8[%c848, %c0_60] : memref<1488x128xf32, #tpu.memory_space<vmem>>, vector<128x128xf32>
    %cst_61 = arith.constant dense<0.000000e+00> : vector<2x128xf32>
    %89 = tpu.matmul %82, %88, %cst_61 {dimension_numbers = #tpu.dot_dimension_numbers<[1], [0], [0], [1], [0, 0, 1, 1], [], []>} : vector<2x128xf32>, vector<128x128xf32>, vector<2x128xf32> -> vector<2x128xf32>
    %90 = arith.addf %87, %89 : vector<2x128xf32>
    %c9 = arith.constant 9 : index
    %c0_62 = arith.constant 0 : index
    %91 = vector.load %arg9[%c9, %c0_62] : memref<16x128xf32, #tpu.memory_space<vmem>>, vector<1x128xf32>
    %92 = vector.broadcast %91 : vector<1x128xf32> to vector<2x128xf32>
    %93 = arith.addf %90, %92 : vector<2x128xf32>
    %cst_63 = arith.constant 0.000000e+00 : f32
    %94 = vector.broadcast %cst_63 : f32 to vector<2x128xf32>
    %95 = arith.maximumf %93, %94 : vector<2x128xf32>
    %c976 = arith.constant 976 : index
    %c0_64 = arith.constant 0 : index
    %96 = vector.load %arg8[%c976, %c0_64] : memref<1488x128xf32, #tpu.memory_space<vmem>>, vector<128x128xf32>
    %cst_65 = arith.constant dense<0.000000e+00> : vector<2x128xf32>
    %97 = tpu.matmul %95, %96, %cst_65 {dimension_numbers = #tpu.dot_dimension_numbers<[1], [0], [0], [1], [0, 0, 1, 1], [], []>} : vector<2x128xf32>, vector<128x128xf32>, vector<2x128xf32> -> vector<2x128xf32>
    %c10 = arith.constant 10 : index
    %c0_66 = arith.constant 0 : index
    %98 = vector.load %arg9[%c10, %c0_66] : memref<16x128xf32, #tpu.memory_space<vmem>>, vector<1x128xf32>
    %99 = vector.broadcast %98 : vector<1x128xf32> to vector<2x128xf32>
    %100 = arith.addf %97, %99 : vector<2x128xf32>
    %cst_67 = arith.constant 0.000000e+00 : f32
    %101 = vector.broadcast %cst_67 : f32 to vector<2x128xf32>
    %102 = arith.maximumf %100, %101 : vector<2x128xf32>
    %c1104 = arith.constant 1104 : index
    %c0_68 = arith.constant 0 : index
    %103 = vector.load %arg8[%c1104, %c0_68] : memref<1488x128xf32, #tpu.memory_space<vmem>>, vector<128x128xf32>
    %cst_69 = arith.constant dense<0.000000e+00> : vector<2x128xf32>
    %104 = tpu.matmul %102, %103, %cst_69 {dimension_numbers = #tpu.dot_dimension_numbers<[1], [0], [0], [1], [0, 0, 1, 1], [], []>} : vector<2x128xf32>, vector<128x128xf32>, vector<2x128xf32> -> vector<2x128xf32>
    %c11 = arith.constant 11 : index
    %c0_70 = arith.constant 0 : index
    %105 = vector.load %arg9[%c11, %c0_70] : memref<16x128xf32, #tpu.memory_space<vmem>>, vector<1x128xf32>
    %106 = vector.broadcast %105 : vector<1x128xf32> to vector<2x128xf32>
    %107 = arith.addf %104, %106 : vector<2x128xf32>
    %cst_71 = arith.constant 0.000000e+00 : f32
    %108 = vector.broadcast %cst_71 : f32 to vector<2x128xf32>
    %109 = arith.subf %108, %107 : vector<2x128xf32>
    %110 = math.exp %109 : vector<2x128xf32>
    %cst_72 = arith.constant 1.000000e+00 : f32
    %111 = vector.broadcast %cst_72 : f32 to vector<2x128xf32>
    %112 = arith.addf %111, %110 : vector<2x128xf32>
    %cst_73 = arith.constant 1.000000e+00 : f32
    %113 = vector.broadcast %cst_73 : f32 to vector<2x128xf32>
    %114 = arith.divf %113, %112 : vector<2x128xf32>
    %c1232 = arith.constant 1232 : index
    %c0_74 = arith.constant 0 : index
    %115 = vector.load %arg8[%c1232, %c0_74] : memref<1488x128xf32, #tpu.memory_space<vmem>>, vector<128x128xf32>
    %cst_75 = arith.constant dense<0.000000e+00> : vector<2x128xf32>
    %116 = tpu.matmul %95, %115, %cst_75 {dimension_numbers = #tpu.dot_dimension_numbers<[1], [0], [0], [1], [0, 0, 1, 1], [], []>} : vector<2x128xf32>, vector<128x128xf32>, vector<2x128xf32> -> vector<2x128xf32>
    %c12 = arith.constant 12 : index
    %c0_76 = arith.constant 0 : index
    %117 = vector.load %arg9[%c12, %c0_76] : memref<16x128xf32, #tpu.memory_space<vmem>>, vector<1x128xf32>
    %118 = vector.broadcast %117 : vector<1x128xf32> to vector<2x128xf32>
    %119 = arith.addf %116, %118 : vector<2x128xf32>
    %cst_77 = arith.constant 0.000000e+00 : f32
    %120 = vector.broadcast %cst_77 : f32 to vector<2x128xf32>
    %121 = arith.maximumf %119, %120 : vector<2x128xf32>
    %c1360 = arith.constant 1360 : index
    %c0_78 = arith.constant 0 : index
    %122 = vector.load %arg8[%c1360, %c0_78] : memref<1488x128xf32, #tpu.memory_space<vmem>>, vector<128x128xf32>
    %cst_79 = arith.constant dense<0.000000e+00> : vector<2x128xf32>
    %123 = tpu.matmul %121, %122, %cst_79 {dimension_numbers = #tpu.dot_dimension_numbers<[1], [0], [0], [1], [0, 0, 1, 1], [], []>} : vector<2x128xf32>, vector<128x128xf32>, vector<2x128xf32> -> vector<2x128xf32>
    %c13 = arith.constant 13 : index
    %c0_80 = arith.constant 0 : index
    %124 = vector.load %arg9[%c13, %c0_80] : memref<16x128xf32, #tpu.memory_space<vmem>>, vector<1x128xf32>
    %125 = vector.broadcast %124 : vector<1x128xf32> to vector<2x128xf32>
    %126 = arith.addf %123, %125 : vector<2x128xf32>
    %c15 = arith.constant 15 : index
    %c0_81 = arith.constant 0 : index
    %127 = vector.load %arg9[%c15, %c0_81] : memref<16x128xf32, #tpu.memory_space<vmem>>, vector<1x128xf32>
    %cst_82 = arith.constant 0.000000e+00 : f32
    %128 = vector.broadcast %cst_82 : f32 to vector<1x128xf32>
    %129 = arith.cmpf ogt, %127, %128 : vector<1x128xf32>
    %cst_83 = arith.constant 0xFF800000 : f32
    %130 = vector.shape_cast %129 : vector<1x128xi1> to vector<1x128xi1>
    %131 = vector.broadcast %130 : vector<1x128xi1> to vector<2x128xi1>
    %132 = vector.broadcast %cst_83 : f32 to vector<2x128xf32>
    %133 = arith.select %131, %126, %132 : vector<2x128xi1>, vector<2x128xf32>
    %cst_84 = arith.constant dense<0xFF800000> : vector<2xf32>
    %134 = vector.multi_reduction <maximumf>, %133, %cst_84 [1] : vector<2x128xf32> to vector<2xf32>
    %135 = vector.shape_cast %134 : vector<2xf32> to vector<2x1xf32>
    %136 = vector.broadcast %135 : vector<2x1xf32> to vector<2x128xf32>
    %137 = arith.subf %126, %136 : vector<2x128xf32>
    %138 = math.exp %137 : vector<2x128xf32>
    %cst_85 = arith.constant 0.000000e+00 : f32
    %139 = vector.shape_cast %129 : vector<1x128xi1> to vector<1x128xi1>
    %140 = vector.broadcast %139 : vector<1x128xi1> to vector<2x128xi1>
    %141 = vector.broadcast %cst_85 : f32 to vector<2x128xf32>
    %142 = arith.select %140, %138, %141 : vector<2x128xi1>, vector<2x128xf32>
    %cst_86 = arith.constant dense<0.000000e+00> : vector<2xf32>
    %143 = vector.multi_reduction <add>, %142, %cst_86 [1] : vector<2x128xf32> to vector<2xf32>
    %144 = vector.shape_cast %143 : vector<2xf32> to vector<2x1xf32>
    %145 = math.log %144 : vector<2x1xf32>
    %146 = vector.broadcast %145 : vector<2x1xf32> to vector<2x128xf32>
    %147 = arith.subf %137, %146 : vector<2x128xf32>
    %c14 = arith.constant 14 : index
    %c0_87 = arith.constant 0 : index
    %148 = vector.load %arg9[%c14, %c0_87] : memref<16x128xf32, #tpu.memory_space<vmem>>, vector<1x128xf32>
    %149 = vector.broadcast %148 : vector<1x128xf32> to vector<2x128xf32>
    %150 = arith.mulf %114, %149 : vector<2x128xf32>
    %151 = arith.addf %95, %150 : vector<2x128xf32>
    %152 = vector.broadcast %127 : vector<1x128xf32> to vector<2x128xf32>
    %153 = arith.mulf %147, %152 : vector<2x128xf32>
    %154 = arith.addf %151, %153 : vector<2x128xf32>
    %c0_88 = arith.constant 0 : index
    %c0_89 = arith.constant 0 : index
    %155 = vector.load %arg10[%c0_88, %c0_89] : memref<2x128xf32, #tpu.memory_space<vmem>>, vector<2x128xf32>
    tpu.vector_store %arg10[%c0_88, %c0_89], %154 {strides = array<i32>} : memref<2x128xf32, #tpu.memory_space<vmem>>, vector<2x128xf32>,
    return
  }
  func.func @transform_0(%arg0: i32) -> (i32, i32) {
    %c0_i32 = arith.constant 0 : i32
    %c0_i32_0 = arith.constant 0 : i32
    return %arg0, %c0_i32 : i32, i32
  }
  func.func @transform_1(%arg0: i32) -> (i32, i32) {
    %c0_i32 = arith.constant 0 : i32
    %c0_i32_0 = arith.constant 0 : i32
    return %arg0, %c0_i32 : i32, i32
  }
  func.func @transform_2(%arg0: i32) -> (i32, i32) {
    %c0_i32 = arith.constant 0 : i32
    %c0_i32_0 = arith.constant 0 : i32
    return %arg0, %c0_i32 : i32, i32
  }
  func.func @transform_3(%arg0: i32) -> (i32, i32) {
    %c0_i32 = arith.constant 0 : i32
    %c0_i32_0 = arith.constant 0 : i32
    return %arg0, %c0_i32 : i32, i32
  }
  func.func @transform_4(%arg0: i32) -> (i32, i32) {
    %c0_i32 = arith.constant 0 : i32
    %c0_i32_0 = arith.constant 0 : i32
    return %arg0, %c0_i32 : i32, i32
  }
  func.func @transform_5(%arg0: i32) -> (i32, i32) {
    %c0_i32 = arith.constant 0 : i32
    %c0_i32_0 = arith.constant 0 : i32
    return %arg0, %c0_i32 : i32, i32
  }
  func.func @transform_6(%arg0: i32) -> (i32, i32) {
    %c0_i32 = arith.constant 0 : i32
    %c0_i32_0 = arith.constant 0 : i32
    %c0_i32_1 = arith.constant 0 : i32
    return %c0_i32, %c0_i32_0 : i32, i32
  }
  func.func @transform_7(%arg0: i32) -> (i32, i32) {
    %c0_i32 = arith.constant 0 : i32
    %c0_i32_0 = arith.constant 0 : i32
    %c0_i32_1 = arith.constant 0 : i32
    return %c0_i32, %c0_i32_0 : i32, i32
  }
  func.func @transform_8(%arg0: i32) -> (i32, i32) {
    %c0_i32 = arith.constant 0 : i32
    %c0_i32_0 = arith.constant 0 : i32
    %c0_i32_1 = arith.constant 0 : i32
    return %c0_i32, %c0_i32_0 : i32, i32
  }
  func.func @transform_9(%arg0: i32) -> (i32, i32) {
    %c0_i32 = arith.constant 0 : i32
    %c0_i32_0 = arith.constant 0 : i32
    return %arg0, %c0_i32 : i32, i32
  }
}

</mosaic_0001>

<bundles_post_ra>
// kernel: ahce_forward.1
= control target key start
LH: loop header
LB: loop body
LE: loop exit
PB: predicated region body
PF: predicated region fallthrough
CT: control target
= control target key end

     0   :  { %14 = vsyncpa [#allocation3], 0  ;;  %s3072_s30 = smov [#allocation2]   ;;  %s3342_s0 = inlined_call_operand.vmem [shape: f32[16,12], index: 0, kind: input, shape index: {}]   ;;  %s3343_s1 = inlined_call_operand.vmem [shape: f32[16,16], index: 1, kind: input, shape index: {}]   ;;  %s3344_s2 = inlined_call_operand.vmem [shape: f32[16,10], index: 2, kind: input, shape index: {}]   ;;  %s3345_s3 = inlined_call_operand.vmem [shape: f32[2,16], index: 3, kind: input, shape index: {}]   ;;  %s3346_s4 = inlined_call_operand.vmem [shape: f32[2,16], index: 4, kind: input, shape index: {}]   ;;  %s3347_s5 = inlined_call_operand.vmem [shape: f32[2,16], index: 5, kind: input, shape index: {}]   ;;  %s3348_s6 = inlined_call_operand.vmem [shape: f32[16,16], index: 6, kind: input, shape index: {}]   ;;  %s3349_s7 = inlined_call_operand.hbm [shape: f32[1488,128], index: 7, kind: input, shape index: {}]   ;;  %s3350_s8 = inlined_call_operand.vmem [shape: f32[16,128], index: 8, kind: input, shape index: {}]   ;;  %s3351_s9 = inlined_call_operand.vmem [shape: f32[2,128], index: 9, kind: output, shape index: {}]  }
   0x1   :  { %s34_s10 = sshll.u32 %s3072_s30, 4  ;;  %s3048_s13 = scalar_lea.hbm %s3349_s7, 23808  ;;  %s35_s10 = int_to_ptr.vmem [resolvable:$true] %s34_s10 }
   0x2   :  { %p3049_p0 = scmp.ne.s32.totalorder %s3349_s7, %s3048_s13  ;;  %p3052_p1 = scmp.lt.u32.totalorder %s3048_s13, %s3349_s7 }
   0x4   :  { %p3054_p2 = pnand %p3052_p1, %p3049_p0 }
   0x6   :  { %3057 = shalt.err (!%p3054_p2)
}
   0x7   :  { %s3058_s18 = scalar_lea.vmem %s35_s10, 23808  ;;  %p3063_p4 = scmp.lt.s32.totalorder %s35_s10, %s35_s10 }
   0x8   :  { %p3059_p3 = scmp.ne.s32.totalorder %s35_s10, %s3058_s18  ;;  %p3064_p5 = scmp.lt.s32.totalorder %s3058_s18, %s3058_s18 }
   0xa   :  { %p3065_p6 = por %p3064_p5, %p3063_p4 }
   0xc   :  { %p3066_p7 = pnand %p3065_p6, %p3059_p3 }
   0xe   :  { %3069 = shalt.err (!%p3066_p7)
}
   0xf   :  { %s3073_s19 = smov 128   ;;  %s3074_s20 = smov 8  }
  0x10   :  { %40 = dma.hbm_to_vmem [thread:$0]  %s3349_s7, 23808, %s35_s10, [#allocation3], %s3073_s19, %s3073_s19, %s3074_s20  }
  0x11   :  { %3070 = dma.done.wait [#allocation3], 23808  }
  0x12   :  { %3071 = vsyncadd [#allocation3], 4294943488  ;;  %vm62_vm0 = vcmask 1043456   ;;  %vm55_vm1 = vcmask 97280   ;;  %vm3075_vm2 = vmmov 1   ;;  %v48_v0 = vld [vmem:[#allocation2] sm:$0xff] }
  0x13   :  { %vm2688_vm3 = vmpackc.low %vm62_vm0, %vm3075_vm2  ;;  %v49_v1 = vld [vmem:[#allocation2 + $0x8] sm:$0xf]  ;;  %v46_v2 = vld [vmem:[%s3342_s0] sm:$0xff]  ;;  %v3076_v36 = vmov 0.0|0.0   ;;  %vm3077_vm4 = vmmov 0   ;;  %v3078_v37 = vmov 0.0  }
  0x14   :  { %v2687_v3 = vpack.c.bf16 %v49_v1, %v48_v0  ;;  %2236 = vmatprep.mubr.msk.f32.mxu0 %vm55_vm1, %v46_v2  ;;  %v143_v4 = vld [vmem:[#allocation2 + $0x10] sm:$0xff]  ;;  %v144_v5 = vld [vmem:[#allocation2 + $0x18] sm:$0xff]  ;;  %v145_v7 = vld [vmem:[#allocation2 + $0x20] sm:$0xff]  ;;  %vm242_vm5 = vcmask 130048   ;;  %vm1040_vm8 = vcmask 1041408   ;;  %vm1033_vm10 = vcmask 80896  }
  0x15   :  { %v2693_v6 = vpack.c.bf16 %v144_v5, %v143_v4  ;;  %v146_v8 = vld [vmem:[#allocation2 + $0x28] sm:$0xff]  ;;  %v147_v10 = vld [vmem:[#allocation2 + $0x30] sm:$0xff]  ;;  %v148_v11 = vld [vmem:[#allocation2 + $0x38] sm:$0xff] }
  0x16   :  { %2689 = vmatprep.subr.msk.bf16.mxu0 %vm2688_vm3, %v2687_v3  ;;  %v2697_v9 = vpack.c.bf16 %v146_v8, %v145_v7  ;;  %v47_v12 = vld [vmem:[%s3342_s0 + $0x8] sm:$0xff]  ;;  %v2701_v13 = vpack.c.bf16 %v148_v11, %v147_v10  ;;  %v149_v14 = vld [vmem:[#allocation2 + $0x40] sm:$0xff]  ;;  %v151_v17 = vld [vmem:[#allocation2 + $0x50] sm:$0xff] }
  0x17   :  { %2692 = vmatpush3.bf16.msk.msra.mxu0 %vm2688_vm3, %v2687_v3  ;;  %2694 = vmatprep.subr.bf16.mxu1 %v2693_v6  ;;  %v150_v15 = vld [vmem:[#allocation2 + $0x48] sm:$0xff]  ;;  %v152_v18 = vld [vmem:[#allocation2 + $0x58] sm:$0xff]  ;;  %v153_v20 = vld [vmem:[#allocation2 + $0x60] sm:$0xff] }
  0x18   :  { %2696 = vmatpush3.bf16.msra.mxu1 %v2693_v6  ;;  %v2705_v16 = vpack.c.bf16 %v150_v15, %v149_v14  ;;  %v2709_v19 = vpack.c.bf16 %v152_v18, %v151_v17  ;;  %v154_v21 = vld [vmem:[#allocation2 + $0x68] sm:$0xff]  ;;  %v155_v23 = vld [vmem:[#allocation2 + $0x70] sm:$0xff]  ;;  %v156_v24 = vld [vmem:[#allocation2 + $0x78] sm:$0xff]  ;;  %2725 = vmatprep.subr.bf16.mxu0 %v3076_v36 }
  0x19   :  { %2698 = vmatprep.subr.bf16.mxu1 %v2697_v9  ;;  %v2713_v22 = vpack.c.bf16 %v154_v21, %v153_v20  ;;  %v2717_v25 = vpack.c.bf16 %v156_v24, %v155_v23  ;;  %v157_v26 = vld [vmem:[#allocation2 + $0x80] sm:$0xff]  ;;  %v158_v27 = vld [vmem:[#allocation2 + $0x88] sm:$0xff]  ;;  %v318_v43 = vld [vmem:[#allocation2 + $0x90] sm:$0xff] }
  0x1a   :  { %2237 = vmatmul.mubr.msk.f32.vlgmr.msra.gmra.mrb[0].mxu0 %vm55_vm1, %v47_v12  ;;  %v2721_v28 = vpack.c.bf16 %v158_v27, %v157_v26  ;;  %v1972_v29 = vld [vmem:[%s3350_s8] ss:$0 sm:$0xff]  ;;  %v1976_v38 = vld [vmem:[%s3350_s8 + $0x1] ss:$0 sm:$0xff]  ;;  %v319_v44 = vld [vmem:[#allocation2 + $0x98] sm:$0xff] }
  0x1b   :  { %2278 = vmatprep.mubr.msk.f32.mxu0 %vm3077_vm4, %v3078_v37  ;;  %v2728_v47 = vpack.c.bf16 %v319_v44, %v318_v43  ;;  %v406_v49 = vld [vmem:[#allocation2 + $0xa0] sm:$0xff]  ;;  %v407_v50 = vld [vmem:[#allocation2 + $0xa8] sm:$0xff]  ;;  %v488_v55 = vld [vmem:[#allocation2 + $0xb0] sm:$0xff] }
  0x1c   :  { %2700 = vmatpush3.bf16.msra.mxu1 %v2697_v9  ;;  %v241_v51 = vld [vmem:[%s3345_s3] sm:$0x3]  ;;  %v2732_v53 = vpack.c.bf16 %v407_v50, %v406_v49  ;;  %v317_v54 = vld [vmem:[%s3343_s1 + $0x8] sm:$0xff]  ;;  %v489_v56 = vld [vmem:[#allocation2 + $0xb8] sm:$0xff] }
  0x1d   :  { %2702 = vmatprep.subr.bf16.mxu1 %v2701_v13  ;;  %v316_v52 = vld [vmem:[%s3343_s1] sm:$0xff]  ;;  %v2736_v57 = vpack.c.bf16 %v489_v56, %v488_v55  ;;  %v646_v14 = vld [vmem:[%s3348_s6 + $0x8] sm:$0xff]  ;;  %v759_v43 = vld [vmem:[#allocation2 + $0xd8] sm:$0xff] }
  0x1e   :  { %v1978_v60 = vld [vmem:[%s3350_s8 + $0x2] ss:$0 sm:$0xff]  ;;  %v1981_v0 = vld [vmem:[%s3350_s8 + $0x3] ss:$0 sm:$0xff]  ;;  %v1984_v7 = vld [vmem:[%s3350_s8 + $0x4] ss:$0 sm:$0xff] }
  0x1f   :  { %vm648_vm7 = vcmp.gt.f32.partialorder %v646_v14, 0.0  ;;  %v762_v50 = vld [vmem:[#allocation2 + $0xf0] sm:$0xff]  ;;  %v860_v14 = vld [vmem:[#allocation2 + $0x180] sm:$0xff]  ;;  %vm2816_vm9 = vmpackc.low %vm1040_vm8, %vm3075_vm2 }
  0x20   :  { %2704 = vmatpush3.bf16.msra.mxu1 %v2701_v13  ;;  %v645_v13 = vld [vmem:[%s3348_s6] sm:$0xff]  ;;  %v766_v56 = vld [vmem:[#allocation2 + $0x110] sm:$0xff] }
  0x21   :  { %2706 = vmatprep.subr.bf16.mxu1 %v2705_v16  ;;  %vm647_vm6 = vcmp.gt.f32.partialorder %v645_v13, 0.0 }
  0x24   :  { %2708 = vmatpush3.bf16.msra.mxu1 %v2705_v16 }
  0x25   :  { %2710 = vmatprep.subr.bf16.mxu1 %v2709_v19 }
  0x28   :  { %2712 = vmatpush3.bf16.msra.mxu1 %v2709_v19 }
  0x29   :  { %2714 = vmatprep.subr.bf16.mxu1 %v2713_v22 }
  0x2c   :  { %2716 = vmatpush3.bf16.msra.mxu1 %v2713_v22 }
  0x2d   :  { %2718 = vmatprep.subr.bf16.mxu1 %v2717_v25 }
  0x30   :  { %2720 = vmatpush3.bf16.msra.mxu1 %v2717_v25 }
  0x31   :  { %2722 = vmatprep.subr.bf16.mxu1 %v2721_v28 }
  0x34   :  { %2724 = vmatpush3.bf16.msra.mxu1 %v2721_v28 }
  0xed   :  { %v2238_v30 = vpop.f32.mrb[0].mxu0 }
  0xee   :  { %v138_v31 = vadd.f32 %v2238_v30, %v1972_v29  ;;  %v132_v32 = vpop.f32.mrb[1].mxu0 }
  0xef   :  { %v133_v33 = vadd.f32 %v1972_v29, %v132_v32 }
  0xf0   :  { %v142_v35 = vmax.f32 %v138_v31, 0.0 }
  0xf1   :  { %v141_v34 = vmax.f32 %v133_v33, 0.0  ;;  %v756_v33 = vld [vmem:[#allocation2 + $0xc0] sm:$0xff] }
  0xf3   :  { %2271 = vmatprep.mubr.f32.mxu1 %v141_v34  ;;  %v757_v34 = vld [vmem:[#allocation2 + $0xc8] sm:$0xff] }
  0xf4   :  { %2272 = vmatmul.mubr.f32.vlgmr.msra.gmra.mrb[0].mxu1 %v142_v35  ;;  %v2748_v35 = vpack.c.bf16 %v757_v34, %v756_v33 }
 0x1c7   :  { %v2273_v39 = vpop.f32.mrb[0].mxu1 }
 0x1c8   :  { %v236_v40 = vadd.f32 %v2273_v39, %v1976_v38  ;;  %v230_v41 = vpop.f32.mrb[1].mxu1 }
 0x1c9   :  { %v231_v42 = vadd.f32 %v1976_v38, %v230_v41 }
 0x1ca   :  { %v240_v45 = vmax.f32 %v236_v40, 0.0 }
 0x1cb   :  { %v239_v46 = vmax.f32 %v231_v42, 0.0  ;;  %v758_v42 = vld [vmem:[#allocation2 + $0xd0] sm:$0xff] }
 0x1cd   :  { %v2726_v48 = vpack.c.bf16 %v240_v45, %v239_v46  ;;  %v2752_v46 = vpack.c.bf16 %v759_v43, %v758_v42 }
 0x1cf   :  { %2727 = vmatpush3.bf16.msra.mxu0 %v2726_v48  ;;  %v761_v48 = vld [vmem:[#allocation2 + $0xe8] sm:$0xff] }
 0x1d0   :  { %2729 = vmatprep.subr.bf16.mxu0 %v2728_v47 }
 0x1d2   :  { %2279 = vmatmul.mubr.msk.f32.vlgmr.msra.gmra.mrb[2].mxu0 %vm242_vm5, %v241_v51  ;;  %v763_v51 = vld [vmem:[#allocation2 + $0xf8] sm:$0xff] }
 0x1d3   :  { %2731 = vmatpush3.bf16.msra.mxu0 %v2728_v47  ;;  %2285 = vmatprep.mubr.msk.f32.mxu0 %vm242_vm5, %v316_v52  ;;  %v760_v47 = vld [vmem:[#allocation2 + $0xe0] sm:$0xff] }
 0x1d4   :  { %2733 = vmatprep.subr.bf16.mxu0 %v2732_v53  ;;  %v2756_v49 = vpack.c.bf16 %v761_v48, %v760_v47  ;;  %v1992_v48 = vld [vmem:[%s3350_s8 + $0x7] ss:$0 sm:$0xff] }
 0x1d6   :  { %2286 = vmatmul.mubr.msk.f32.vlgmr.msra.gmra.mrb[4].mxu0 %vm242_vm5, %v317_v54 }
 0x1d7   :  { %2735 = vmatpush3.bf16.msra.mxu0 %v2732_v53  ;;  %2292 = vmatprep.mubr.msk.f32.mxu0 %vm242_vm5, %v316_v52  ;;  %v764_v53 = vld [vmem:[#allocation2 + $0x100] sm:$0xff] }
 0x1d8   :  { %2737 = vmatprep.subr.bf16.mxu0 %v2736_v57 }
 0x1da   :  { %2293 = vmatmul.mubr.msk.f32.vlgmr.msra.gmra.mrb[6].mxu0 %vm242_vm5, %v317_v54 }
 0x1db   :  { %2299 = vmatprep.mubr.msk.f32.mxu0 %vm242_vm5, %v316_v52  ;;  %2739 = vmatpush3.bf16.msra.mxu0 %v2736_v57  ;;  %v2760_v52 = vpack.c.bf16 %v763_v51, %v762_v50  ;;  %v767_v57 = vld [vmem:[#allocation2 + $0x118] sm:$0xff] }
 0x1de   :  { %2300 = vmatmul.mubr.msk.f32.vlgmr.msra.gmra.mrb[8].mxu0 %vm242_vm5, %v317_v54  ;;  %v765_v54 = vld [vmem:[#allocation2 + $0x108] sm:$0xff] }
 0x1df   :  { %v2764_v55 = vpack.c.bf16 %v765_v54, %v764_v53  ;;  %v1123_v54 = vld [vmem:[#allocation2 + $0x1e0] sm:$0xff] }
 0x2a5   :  { %v3176_v58 = vpop.f32.mrb[2].mxu0 }
 0x2a6   :  { %v2280_v59 = vpop.f32.mrb[3].mxu0 }
 0x2a7   :  { %v2768_v59 = vpack.c.bf16 %v767_v57, %v766_v56  ;;  %v950_v57 = vld [vmem:[%s3346_s4] sm:$0x3] }
 0x2a9   :  { %v2287_v61 = vpop.f32.mrb[4].mxu0 }
 0x2aa   :  { %v397_v62 = vpop.f32.mrb[5].mxu0  ;;  %v403_v6 = vadd.f32 %v2287_v61, %v1978_v60  ;;  %v769_v61 = vld [vmem:[#allocation2 + $0x128] sm:$0xff] }
 0x2ab   :  { %v398_v63 = vadd.f32 %v1978_v60, %v397_v62  ;;  %v768_v60 = vld [vmem:[#allocation2 + $0x120] sm:$0xff] }
 0x2ac   :  { %v2772_v62 = vpack.c.bf16 %v769_v61, %v768_v60  ;;  %v1125_v61 = vld [vmem:[#allocation2 + $0x1f0] sm:$0xff] }
 0x2ad   :  { %v2294_v1 = vpop.f32.mrb[6].mxu0  ;;  %2306 = vmatprep.mubr.f32.mxu0 %v398_v63  ;;  %v770_v63 = vld [vmem:[#allocation2 + $0x130] sm:$0xff] }
 0x2ae   :  { %v485_v2 = vadd.f32 %v2294_v1, %v1981_v0  ;;  %v479_v3 = vpop.f32.mrb[7].mxu0 }
 0x2af   :  { %v480_v4 = vadd.f32 %v1981_v0, %v479_v3  ;;  %v771_v0 = vld [vmem:[#allocation2 + $0x138] sm:$0xff]  ;;  %v853_v3 = vld [vmem:[#allocation2 + $0x148] sm:$0xff] }
 0x2b0   :  { %v2776_v1 = vpack.c.bf16 %v771_v0, %v770_v63  ;;  %v1127_v0 = vld [vmem:[#allocation2 + $0x200] sm:$0xff] }
 0x2b1   :  { %v2740_v5 = vpack.c.bf16 %v485_v2, %v480_v4  ;;  %v2301_v8 = vpop.f32.mrb[8].mxu0  ;;  %v852_v2 = vld [vmem:[#allocation2 + $0x140] sm:$0xff]  ;;  %v854_v4 = vld [vmem:[#allocation2 + $0x150] sm:$0xff] }
 0x2b2   :  { %v567_v9 = vadd.f32 %v2301_v8, %v1984_v7  ;;  %v561_v10 = vpop.f32.mrb[9].mxu0  ;;  %v856_v8 = vld [vmem:[#allocation2 + $0x160] sm:$0xff] }
 0x2b3   :  { %2741 = vmatprep.subr.bf16.mxu0 %v2740_v5  ;;  %v562_v11 = vadd.f32 %v1984_v7, %v561_v10 }
 0x2b4   :  { %2743 = vmatpush3.bf16.xpose.msra.mxu0 %v2740_v5  ;;  %v2780_v5 = vpack.c.bf16 %v853_v3, %v852_v2  ;;  %v1129_v3 = vld [vmem:[#allocation2 + $0x210] sm:$0xff] }
 0x2b5   :  { %v2744_v12 = vpack.c.bf16 %v567_v9, %v562_v11  ;;  %v857_v9 = vld [vmem:[#allocation2 + $0x168] sm:$0xff]  ;;  %v858_v11 = vld [vmem:[#allocation2 + $0x170] sm:$0xff] }
 0x2b6   :  { %2781 = vmatprep.subr.bf16.mxu1 %v2780_v5  ;;  %v2788_v10 = vpack.c.bf16 %v857_v9, %v856_v8  ;;  %v1133_v9 = vld [vmem:[#allocation2 + $0x230] sm:$0xff] }
 0x2b7   :  { %2745 = vmatprep.subr.bf16.mxu0 %v2744_v12  ;;  %2783 = vmatpush3.bf16.msra.mxu1 %v2780_v5 }
 0x2bb   :  { %2307 = vmatmul.mubr.f32.vlgmr.msra.gmra.mrb[10].mxu0 %v403_v6  ;;  %v855_v6 = vld [vmem:[#allocation2 + $0x158] sm:$0xff] }
 0x2bc   :  { %2747 = vmatpush3.bf16.msra.mxu0 %v2744_v12  ;;  %v2784_v7 = vpack.c.bf16 %v855_v6, %v854_v4  ;;  %v859_v12 = vld [vmem:[#allocation2 + $0x178] sm:$0xff]  ;;  %v1131_v6 = vld [vmem:[#allocation2 + $0x220] sm:$0xff] }
 0x2bd   :  { %2749 = vmatprep.subr.bf16.mxu0 %v2748_v35  ;;  %v2792_v13 = vpack.c.bf16 %v859_v12, %v858_v11  ;;  %v1130_v4 = vld [vmem:[#allocation2 + $0x218] sm:$0xff]  ;;  %v1135_v12 = vld [vmem:[#allocation2 + $0x240] sm:$0xff] }
 0x2be   :  { %2785 = vmatprep.subr.bf16.mxu1 %v2784_v7  ;;  %v2837_v5 = vpack.c.bf16 %v1130_v4, %v1129_v3  ;;  %v1318_v3 = vld [vmem:[#allocation2 + $0x318] sm:$0xff] }
 0x2bf   :  { %2787 = vmatpush3.bf16.msra.mxu1 %v2784_v7  ;;  %v1132_v7 = vld [vmem:[#allocation2 + $0x228] sm:$0xff] }
 0x2c0   :  { %2789 = vmatprep.subr.bf16.mxu1 %v2788_v10  ;;  %v2841_v8 = vpack.c.bf16 %v1132_v7, %v1131_v6  ;;  %v1320_v6 = vld [vmem:[#allocation2 + $0x328] sm:$0xff] }
 0x2c3   :  { %2791 = vmatpush3.bf16.msra.mxu1 %v2788_v10  ;;  %v1134_v10 = vld [vmem:[#allocation2 + $0x238] sm:$0xff] }
 0x2c4   :  { %2793 = vmatprep.subr.bf16.mxu1 %v2792_v13  ;;  %v2845_v11 = vpack.c.bf16 %v1134_v10, %v1133_v9  ;;  %v1322_v9 = vld [vmem:[#allocation2 + $0x338] sm:$0xff] }
 0x2c7   :  { %2795 = vmatpush3.bf16.msra.mxu1 %v2792_v13  ;;  %v1136_v13 = vld [vmem:[#allocation2 + $0x248] sm:$0xff] }
 0x38e   :  { %v2308_v15 = vpop.f32.mrb[10].mxu0 }
 0x38f   :  { %v636_v16 = vpop.f32.mrb[11].mxu0  ;;  %v650_v19 = vsel %vm648_vm7, %v2308_v15, -inf }
 0x390   :  { %v649_v17 = vsel %vm647_vm6, %v636_v16, -inf  ;;  %v654_v20 = vsel %vm242_vm5, %v650_v19, -inf }
 0x391   :  { %v651_v18 = vsel %vm242_vm5, %v649_v17, -inf  ;;  %v862_v17 = vld [vmem:[#allocation2 + $0x190] sm:$0xff] }
 0x392   :  { %652 = vmax.xlane.f32.xlu0 %v651_v18  ;;  %v863_v18 = vld [vmem:[#allocation2 + $0x198] sm:$0xff] }
 0x393   :  { %v2800_v19 = vpack.c.bf16 %v863_v18, %v862_v17  ;;  %v1294_v17 = vld [vmem:[#allocation2 + $0x258] sm:$0xff] }
 0x396   :  { %655 = vmax.xlane.f32.xlu0 %v654_v20  ;;  %v864_v20 = vld [vmem:[#allocation2 + $0x1a0] sm:$0xff] }
 0x41f   :  { %v653_v21 = vpop.xlane.xlu0 %652 }
 0x420   :  { %v657_v22 = vsub.f32 %v636_v16, %v653_v21  ;;  %v865_v21 = vld [vmem:[#allocation2 + $0x1a8] sm:$0xff] }
 0x422   :  { %v659_v23 = vmul.f32 1.442695, %v657_v22  ;;  %v2804_v22 = vpack.c.bf16 %v865_v21, %v864_v20  ;;  %v1295_v20 = vld [vmem:[#allocation2 + $0x260] sm:$0xff]  ;;  %v1296_v21 = vld [vmem:[#allocation2 + $0x268] sm:$0xff] }
 0x423   :  { %v656_v24 = vpop.xlane.xlu0 %655 }
 0x424   :  { %3032 = vpow2.f32 %v659_v23  ;;  %v658_v25 = vsub.f32 %v2308_v15, %v656_v24  ;;  %v861_v15 = vld [vmem:[#allocation2 + $0x188] sm:$0xff] }
 0x425   :  { %v2796_v16 = vpack.c.bf16 %v861_v15, %v860_v14  ;;  %v2849_v14 = vpack.c.bf16 %v1136_v13, %v1135_v12  ;;  %v1323_v13 = vld [vmem:[#allocation2 + $0x340] sm:$0xff] }
 0x426   :  { %v661_v26 = vmul.f32 1.442695, %v658_v25  ;;  %v866_v25 = vld [vmem:[#allocation2 + $0x1b0] sm:$0xff] }
 0x427   :  { %2797 = vmatprep.subr.bf16.mxu1 %v2796_v16 }
 0x428   :  { %3034 = vpow2.f32 %v661_v26  ;;  %2799 = vmatpush3.bf16.msra.mxu1 %v2796_v16  ;;  %v867_v26 = vld [vmem:[#allocation2 + $0x1b8] sm:$0xff]  ;;  %v1293_v16 = vld [vmem:[#allocation2 + $0x250] sm:$0xff] }
 0x429   :  { %2801 = vmatprep.subr.bf16.mxu1 %v2800_v19  ;;  %v2881_v18 = vpack.c.bf16 %v1294_v17, %v1293_v16  ;;  %v1465_v16 = vld [vmem:[#allocation2 + $0x350] sm:$0xff]  ;;  %v1466_v17 = vld [vmem:[#allocation2 + $0x358] sm:$0xff] }
 0x42c   :  { %2803 = vmatpush3.bf16.msra.mxu1 %v2800_v19 }
 0x42d   :  { %2805 = vmatprep.subr.bf16.mxu1 %v2804_v22 }
 0x42e   :  { %v3033_v27 = vpop.eup %3032 }
 0x42f   :  { %v663_v28 = vsel %vm647_vm6, %v3033_v27, 0.0  ;;  %v2808_v27 = vpack.c.bf16 %v867_v26, %v866_v25  ;;  %v1299_v26 = vld [vmem:[#allocation2 + $0x280] sm:$0xff] }
 0x430   :  { %v665_v29 = vsel %vm242_vm5, %v663_v28, 0.0  ;;  %2807 = vmatpush3.bf16.msra.mxu1 %v2804_v22  ;;  %v2884_v22 = vpack.c.bf16 %v1296_v21, %v1295_v20  ;;  %v1468_v20 = vld [vmem:[#allocation2 + $0x368] sm:$0xff] }
 0x431   :  { %666 = vadd.xlane.f32.xlu1 %v665_v29  ;;  %2809 = vmatprep.subr.bf16.mxu1 %v2808_v27  ;;  %v1027_v29 = vld [vmem:[#allocation2 + $0x1c8] sm:$0x3] }
 0x432   :  { %v3035_v30 = vpop.eup %3034 }
 0x433   :  { %v664_v31 = vsel %vm648_vm7, %v3035_v30, 0.0 }
 0x434   :  { %v668_v32 = vsel %vm242_vm5, %v664_v31, 0.0  ;;  %2811 = vmatpush3.bf16.msra.mxu1 %v2808_v27  ;;  %v1300_v27 = vld [vmem:[#allocation2 + $0x288] sm:$0xff] }
 0x435   :  { %669 = vadd.xlane.f32.xlu1 %v668_v32 }
 0x4be   :  { %v667_v38 = vpop.xlane.xlu1 %666 }
 0x4bf   :  { %3036 = vrcp.f32 %v667_v38  ;;  %v1024_v38 = vld [vmem:[%s3344_s2] sm:$0xff] }
 0x4c2   :  { %v670_v39 = vpop.xlane.xlu1 %669 }
 0x4c3   :  { %3038 = vrcp.f32 %v670_v39  ;;  %v1025_v39 = vld [vmem:[%s3344_s2 + $0x8] sm:$0xff] }
 0x4c9   :  { %v3037_v40 = vpop.eup %3036 }
 0x4ca   :  { %v672_v41 = vmul.f32 %v3037_v40, %v663_v28  ;;  %v1026_v28 = vld [vmem:[#allocation2 + $0x1c0] sm:$0xff] }
 0x4cb   :  { %v2815_v30 = vpack.c.bf16 %v1027_v29, %v1026_v28  ;;  %v1990_v40 = vld [vmem:[%s3350_s8 + $0x6] ss:$0 sm:$0xff]  ;;  %v2890_v28 = vpack.c.bf16 %v1300_v27, %v1299_v26  ;;  %v1301_v29 = vld [vmem:[#allocation2 + $0x290] sm:$0xff]  ;;  %v1472_v26 = vld [vmem:[#allocation2 + $0x388] sm:$0xff] }
 0x4cc   :  { %2313 = vmatprep.mubr.msk.f32.mxu0 %vm242_vm5, %v672_v41 }
 0x4cd   :  { %v3039_v44 = vpop.eup %3038  ;;  %2817 = vmatprep.subr.msk.bf16.mxu1 %vm2816_vm9, %v2815_v30 }
 0x4ce   :  { %v674_v45 = vmul.f32 %v3039_v44, %v664_v31  ;;  %v1989_v31 = vld [vmem:[%s3350_s8 + $0x5] ss:$0 sm:$0xff] }
 0x4d0   :  { %2314 = vmatmul.mubr.msk.f32.vlgmr.msra.gmra.mrb[12].mxu0 %vm242_vm5, %v674_v45  ;;  %v1121_v45 = vld [vmem:[#allocation2 + $0x1d0] sm:$0xff] }
 0x4d1   :  { %2751 = vmatpush3.bf16.msra.mxu0 %v2748_v35 }
 0x4d2   :  { %2753 = vmatprep.subr.bf16.mxu0 %v2752_v46 }
 0x4d5   :  { %2755 = vmatpush3.bf16.msra.mxu0 %v2752_v46  ;;  %v1122_v46 = vld [vmem:[#allocation2 + $0x1d8] sm:$0xff] }
 0x4d6   :  { %2757 = vmatprep.subr.bf16.mxu0 %v2756_v49  ;;  %v2821_v51 = vpack.c.bf16 %v1122_v46, %v1121_v45  ;;  %v1996_v45 = vld [vmem:[%s3350_s8 + $0x8] ss:$0 sm:$0xff] }
 0x4d9   :  { %2759 = vmatpush3.bf16.msra.mxu0 %v2756_v49 }
 0x4da   :  { %2761 = vmatprep.subr.bf16.mxu0 %v2760_v52 }
 0x4dd   :  { %2763 = vmatpush3.bf16.msra.mxu0 %v2760_v52 }
 0x4de   :  { %2765 = vmatprep.subr.bf16.mxu0 %v2764_v55 }
 0x4e1   :  { %2767 = vmatpush3.bf16.msra.mxu0 %v2764_v55  ;;  %v1124_v55 = vld [vmem:[#allocation2 + $0x1e8] sm:$0xff] }
 0x4e2   :  { %2769 = vmatprep.subr.bf16.mxu0 %v2768_v59  ;;  %v2825_v60 = vpack.c.bf16 %v1124_v55, %v1123_v54 }
 0x4e5   :  { %2771 = vmatpush3.bf16.msra.mxu0 %v2768_v59 }
 0x4e6   :  { %2773 = vmatprep.subr.bf16.mxu0 %v2772_v62 }
 0x4e9   :  { %2775 = vmatpush3.bf16.msra.mxu0 %v2772_v62  ;;  %v1126_v62 = vld [vmem:[#allocation2 + $0x1f8] sm:$0xff] }
 0x4ea   :  { %2777 = vmatprep.subr.bf16.mxu0 %v2776_v1  ;;  %v2829_v63 = vpack.c.bf16 %v1126_v62, %v1125_v61  ;;  %v1314_v61 = vld [vmem:[#allocation2 + $0x2f8] sm:$0xff] }
 0x4ed   :  { %2779 = vmatpush3.bf16.msra.mxu0 %v2776_v1  ;;  %v1128_v1 = vld [vmem:[#allocation2 + $0x208] sm:$0xff] }
 0x4ee   :  { %2812 = vmatprep.subr.bf16.mxu0 %v3076_v36  ;;  %v2833_v2 = vpack.c.bf16 %v1128_v1, %v1127_v0  ;;  %v1316_v0 = vld [vmem:[#allocation2 + $0x308] sm:$0xff] }
 0x5a3   :  { %v2315_v23 = vpop.f32.mrb[12].mxu0 }
 0x5a4   :  { %v747_v24 = vpop.f32.mrb[13].mxu0 }
 0x5a5   :  { %2348 = vmatprep.mubr.f32.mxu0 %v747_v24  ;;  %v1298_v24 = vld [vmem:[#allocation2 + $0x278] sm:$0xff] }
 0x5a6   :  { %2349 = vmatmul.mubr.f32.vlgmr.msra.gmra.mrb[14].mxu0 %v2315_v23  ;;  %v1297_v23 = vld [vmem:[#allocation2 + $0x270] sm:$0xff] }
 0x5a7   :  { %2390 = vmatprep.mubr.msk.f32.mxu0 %vm3077_vm4, %v3078_v37  ;;  %v2887_v25 = vpack.c.bf16 %v1298_v24, %v1297_v23  ;;  %v1470_v23 = vld [vmem:[#allocation2 + $0x378] sm:$0xff] }
 0x679   :  { %v2350_v32 = vpop.f32.mrb[14].mxu0 }
 0x67a   :  { %v843_v33 = vpop.f32.mrb[15].mxu0  ;;  %v849_v35 = vadd.f32 %v2350_v32, %v1989_v31  ;;  %v1303_v32 = vld [vmem:[#allocation2 + $0x2a0] sm:$0xff] }
 0x67b   :  { %v844_v34 = vadd.f32 %v1989_v31, %v843_v33  ;;  %v1304_v33 = vld [vmem:[#allocation2 + $0x2a8] sm:$0xff] }
 0x67d   :  { %2383 = vmatprep.mubr.f32.mxu1 %v844_v34  ;;  %v2896_v34 = vpack.c.bf16 %v1304_v33, %v1303_v32  ;;  %v1476_v32 = vld [vmem:[#allocation2 + $0x3a8] sm:$0xff] }
 0x67e   :  { %2384 = vmatmul.mubr.f32.vlgmr.msra.gmra.mrb[2].mxu1 %v849_v35  ;;  %v1305_v35 = vld [vmem:[#allocation2 + $0x2b0] sm:$0xff] }
 0x67f   :  { %2820 = vmatpush3.bf16.msk.msra.mxu1 %vm2816_vm9, %v2815_v30  ;;  %2397 = vmatprep.mubr.msk.f32.mxu1 %vm1033_vm10, %v1024_v38  ;;  %v1302_v30 = vld [vmem:[#allocation2 + $0x298] sm:$0xff] }
 0x680   :  { %2853 = vmatprep.subr.bf16.mxu1 %v3076_v36  ;;  %v2893_v31 = vpack.c.bf16 %v1302_v30, %v1301_v29  ;;  %v1306_v38 = vld [vmem:[#allocation2 + $0x2b8] sm:$0xff] }
 0x681   :  { %v1474_v29 = vld [vmem:[#allocation2 + $0x398] sm:$0xff] }
 0x682   :  { %2398 = vmatmul.mubr.msk.f32.vlgmr.msra.gmra.mrb[4].mxu1 %vm1033_vm10, %v1025_v39  ;;  %v2899_v39 = vpack.c.bf16 %v1306_v38, %v1305_v35  ;;  %v1478_v35 = vld [vmem:[#allocation2 + $0x3b8] sm:$0xff] }
 0x683   :  { %2439 = vmatprep.mubr.msk.f32.mxu1 %vm3077_vm4, %v3078_v37 }
 0x751   :  { %v2385_v41 = vpop.f32.mrb[2].mxu1 }
 0x752   :  { %v945_v42 = vadd.f32 %v2385_v41, %v1990_v40  ;;  %v939_v43 = vpop.f32.mrb[3].mxu1  ;;  %v1308_v41 = vld [vmem:[#allocation2 + $0x2c8] sm:$0xff] }
 0x753   :  { %v940_v44 = vadd.f32 %v1990_v40, %v939_v43  ;;  %v1307_v40 = vld [vmem:[#allocation2 + $0x2c0] sm:$0xff] }
 0x754   :  { %v949_v47 = vmax.f32 %v945_v42, 0.0  ;;  %v2902_v42 = vpack.c.bf16 %v1308_v41, %v1307_v40  ;;  %v1480_v40 = vld [vmem:[#allocation2 + $0x3c8] sm:$0xff] }
 0x755   :  { %v948_v49 = vmax.f32 %v940_v44, 0.0  ;;  %v2399_v50 = vpop.f32.mrb[4].mxu1 }
 0x756   :  { %v1110_v52 = vpop.f32.mrb[5].mxu1  ;;  %v1116_v15 = vadd.f32 %v2399_v50, %v1992_v48 }
 0x757   :  { %v2813_v53 = vpack.c.bf16 %v949_v47, %v948_v49  ;;  %v1111_v56 = vadd.f32 %v1992_v48, %v1110_v52  ;;  %v1309_v52 = vld [vmem:[#allocation2 + $0x2d0] sm:$0xff] }
 0x758   :  { %v1120_v19 = vmax.f32 %v1116_v15, 0.0 }
 0x759   :  { %2814 = vmatpush3.bf16.msra.mxu0 %v2813_v53  ;;  %v1119_v59 = vmax.f32 %v1111_v56, 0.0  ;;  %v1310_v53 = vld [vmem:[#allocation2 + $0x2d8] sm:$0xff]  ;;  %v1311_v56 = vld [vmem:[#allocation2 + $0x2e0] sm:$0xff] }
 0x75a   :  { %2822 = vmatprep.subr.bf16.mxu0 %v2821_v51  ;;  %v2857_v55 = vpack.c.bf16 %v1310_v53, %v1309_v52  ;;  %v1566_v52 = vld [vmem:[#allocation2 + $0x408] sm:$0xff] }
 0x75c   :  { %2391 = vmatmul.mubr.msk.f32.vlgmr.msra.gmra.mrb[16].mxu0 %vm242_vm5, %v950_v57  ;;  %v1312_v57 = vld [vmem:[#allocation2 + $0x2e8] sm:$0xff] }
 0x75d   :  { %2824 = vmatpush3.bf16.msra.mxu0 %v2821_v51  ;;  %2432 = vmatprep.mubr.f32.mxu0 %v1119_v59  ;;  %v2860_v59 = vpack.c.bf16 %v1312_v57, %v1311_v56  ;;  %v1569_v56 = vld [vmem:[#allocation2 + $0x420] sm:$0xff]  ;;  %v1570_v57 = vld [vmem:[#allocation2 + $0x428] sm:$0xff] }
 0x75e   :  { %2826 = vmatprep.subr.bf16.mxu0 %v2825_v60 }
 0x761   :  { %2828 = vmatpush3.bf16.msra.mxu0 %v2825_v60  ;;  %v1313_v60 = vld [vmem:[#allocation2 + $0x2f0] sm:$0xff] }
 0x762   :  { %2830 = vmatprep.subr.bf16.mxu0 %v2829_v63  ;;  %v2863_v62 = vpack.c.bf16 %v1314_v61, %v1313_v60  ;;  %v1571_v60 = vld [vmem:[#allocation2 + $0x430] sm:$0xff]  ;;  %v1572_v61 = vld [vmem:[#allocation2 + $0x438] sm:$0xff] }
 0x765   :  { %2832 = vmatpush3.bf16.msra.mxu0 %v2829_v63  ;;  %v1315_v63 = vld [vmem:[#allocation2 + $0x300] sm:$0xff] }
 0x766   :  { %2834 = vmatprep.subr.bf16.mxu0 %v2833_v2  ;;  %v2866_v1 = vpack.c.bf16 %v1316_v0, %v1315_v63 }
 0x769   :  { %2836 = vmatpush3.bf16.msra.mxu0 %v2833_v2  ;;  %v1317_v2 = vld [vmem:[#allocation2 + $0x310] sm:$0xff] }
 0x76a   :  { %2838 = vmatprep.subr.bf16.mxu0 %v2837_v5  ;;  %v2869_v4 = vpack.c.bf16 %v1318_v3, %v1317_v2 }
 0x76d   :  { %2840 = vmatpush3.bf16.msra.mxu0 %v2837_v5  ;;  %v1319_v5 = vld [vmem:[#allocation2 + $0x320] sm:$0xff] }
 0x76e   :  { %2842 = vmatprep.subr.bf16.mxu0 %v2841_v8  ;;  %v2872_v7 = vpack.c.bf16 %v1320_v6, %v1319_v5  ;;  %v1574_v5 = vld [vmem:[#allocation2 + $0x448] sm:$0xff] }
 0x771   :  { %2844 = vmatpush3.bf16.msra.mxu0 %v2841_v8  ;;  %v1321_v8 = vld [vmem:[#allocation2 + $0x330] sm:$0xff] }
 0x772   :  { %2846 = vmatprep.subr.bf16.mxu0 %v2845_v11 }
 0x775   :  { %2848 = vmatpush3.bf16.msra.mxu0 %v2845_v11  ;;  %v2875_v11 = vpack.c.bf16 %v1322_v9, %v1321_v8  ;;  %v1652_v8 = vld [vmem:[#allocation2 + $0x458] sm:$0xff]  ;;  %v1653_v9 = vld [vmem:[#allocation2 + $0x460] sm:$0xff] }
 0x776   :  { %2850 = vmatprep.subr.bf16.mxu0 %v2849_v14 }
 0x779   :  { %2852 = vmatpush3.bf16.msra.mxu0 %v2849_v14  ;;  %v1324_v14 = vld [vmem:[#allocation2 + $0x348] sm:$0xff] }
 0x77a   :  { %2880 = vmatprep.subr.bf16.mxu0 %v3076_v36  ;;  %v2878_v15 = vpack.c.bf16 %v1324_v14, %v1323_v13  ;;  %v1655_v14 = vld [vmem:[#allocation2 + $0x470] sm:$0xff] }
 0x77c   :  { %2433 = vmatmul.mubr.f32.vlgmr.msra.gmra.mrb[18].mxu0 %v1120_v19  ;;  %v1467_v19 = vld [vmem:[#allocation2 + $0x360] sm:$0xff] }
 0x77d   :  { %2882 = vmatpush3.bf16.msra.mxu0 %v2881_v18  ;;  %2509 = vmatprep.mubr.msk.f32.mxu0 %vm3077_vm4, %v3078_v37  ;;  %v2905_v18 = vpack.c.bf16 %v1466_v17, %v1465_v16  ;;  %v2908_v21 = vpack.c.bf16 %v1468_v20, %v1467_v19  ;;  %v1657_v16 = vld [vmem:[#allocation2 + $0x480] sm:$0xff]  ;;  %v1658_v17 = vld [vmem:[#allocation2 + $0x488] sm:$0xff]  ;;  %v1659_v19 = vld [vmem:[#allocation2 + $0x490] sm:$0xff] }
 0x77e   :  { %2883 = vmatprep.subr.bf16.mxu0 %v3076_v36  ;;  %v1660_v20 = vld [vmem:[#allocation2 + $0x498] sm:$0xff] }
 0x781   :  { %2885 = vmatpush3.bf16.msra.mxu0 %v2884_v22  ;;  %v1469_v22 = vld [vmem:[#allocation2 + $0x370] sm:$0xff] }
 0x782   :  { %2886 = vmatprep.subr.bf16.mxu0 %v3076_v36  ;;  %v2911_v24 = vpack.c.bf16 %v1470_v23, %v1469_v22  ;;  %v1661_v22 = vld [vmem:[#allocation2 + $0x4a0] sm:$0xff]  ;;  %v1662_v23 = vld [vmem:[#allocation2 + $0x4a8] sm:$0xff] }
 0x785   :  { %2888 = vmatpush3.bf16.msra.mxu0 %v2887_v25  ;;  %v1471_v25 = vld [vmem:[#allocation2 + $0x380] sm:$0xff] }
 0x786   :  { %2889 = vmatprep.subr.bf16.mxu0 %v3076_v36  ;;  %v2914_v27 = vpack.c.bf16 %v1472_v26, %v1471_v25  ;;  %v1663_v25 = vld [vmem:[#allocation2 + $0x4b0] sm:$0xff]  ;;  %v1664_v26 = vld [vmem:[#allocation2 + $0x4b8] sm:$0xff] }
 0x789   :  { %2891 = vmatpush3.bf16.msra.mxu0 %v2890_v28  ;;  %v1473_v28 = vld [vmem:[#allocation2 + $0x390] sm:$0xff] }
 0x78a   :  { %2892 = vmatprep.subr.bf16.mxu0 %v3076_v36  ;;  %v2917_v30 = vpack.c.bf16 %v1474_v29, %v1473_v28  ;;  %v1998_v29 = vld [vmem:[%s3350_s8 + $0x9] ss:$0 sm:$0xff] }
 0x78d   :  { %2894 = vmatpush3.bf16.msra.mxu0 %v2893_v31  ;;  %v1475_v31 = vld [vmem:[#allocation2 + $0x3a0] sm:$0xff] }
 0x78e   :  { %2895 = vmatprep.subr.bf16.mxu0 %v3076_v36  ;;  %v2920_v33 = vpack.c.bf16 %v1476_v32, %v1475_v31  ;;  %v1748_v32 = vld [vmem:[#allocation2 + $0x4d0] sm:$0xff] }
 0x791   :  { %2897 = vmatpush3.bf16.msra.mxu0 %v2896_v34  ;;  %v1477_v34 = vld [vmem:[#allocation2 + $0x3b0] sm:$0xff] }
 0x792   :  { %2898 = vmatprep.subr.bf16.mxu0 %v3076_v36  ;;  %v2923_v38 = vpack.c.bf16 %v1478_v35, %v1477_v34 }
 0x795   :  { %2900 = vmatpush3.bf16.msra.mxu0 %v2899_v39  ;;  %v1479_v39 = vld [vmem:[#allocation2 + $0x3c0] sm:$0xff] }
 0x796   :  { %2901 = vmatprep.subr.bf16.mxu0 %v3076_v36  ;;  %v2926_v41 = vpack.c.bf16 %v1480_v40, %v1479_v39  ;;  %v1750_v39 = vld [vmem:[#allocation2 + $0x4e0] sm:$0xff]  ;;  %v1751_v40 = vld [vmem:[#allocation2 + $0x4e8] sm:$0xff] }
 0x799   :  { %2903 = vmatpush3.bf16.msra.mxu0 %v2902_v42  ;;  %v1559_v42 = vld [vmem:[#allocation2 + $0x3d0] sm:$0xff] }
 0x79a   :  { %2928 = vmatprep.subr.bf16.mxu0 %v3076_v36 }
 0x79c   :  { %2510 = vmatmul.mubr.f32.vlgmr.msra.gmra.mrb[20].mxu0 %v3176_v58  ;;  %v1219_v58 = vld [vmem:[%s3347_s5] sm:$0x3] }
 0x79d   :  { %2579 = vmatprep.mubr.msk.f32.mxu0 %vm3077_vm4, %v3078_v37 }
 0x82f   :  { %v1020_v43 = vpop.f32.mrb[16].mxu0 }
 0x830   :  { %v2392_v44 = vpop.f32.mrb[17].mxu0 }
 0x831   :  { %v1561_v44 = vld [vmem:[#allocation2 + $0x3e0] sm:$0xff] }
 0x84f   :  { %v2434_v46 = vpop.f32.mrb[18].mxu0 }
 0x850   :  { %v1214_v47 = vadd.f32 %v2434_v46, %v1996_v45  ;;  %v1208_v48 = vpop.f32.mrb[19].mxu0  ;;  %v1562_v46 = vld [vmem:[#allocation2 + $0x3e8] sm:$0xff] }
 0x851   :  { %v1209_v49 = vadd.f32 %v1996_v45, %v1208_v48  ;;  %v1563_v48 = vld [vmem:[#allocation2 + $0x3f0] sm:$0xff] }
 0x852   :  { %v1218_v50 = vmax.f32 %v1214_v47, 0.0  ;;  %v2932_v47 = vpack.c.bf16 %v1562_v46, %v1561_v44  ;;  %v1755_v46 = vld [vmem:[#allocation2 + $0x508] sm:$0xff] }
 0x853   :  { %v1217_v51 = vmax.f32 %v1209_v49, 0.0  ;;  %v1564_v49 = vld [vmem:[#allocation2 + $0x3f8] sm:$0xff] }
 0x855   :  { %v2854_v54 = vpack.c.bf16 %v1218_v50, %v1217_v51  ;;  %v2935_v50 = vpack.c.bf16 %v1564_v49, %v1563_v48  ;;  %v1565_v51 = vld [vmem:[#allocation2 + $0x400] sm:$0xff]  ;;  %v1756_v48 = vld [vmem:[#allocation2 + $0x510] sm:$0xff]  ;;  %v1757_v49 = vld [vmem:[#allocation2 + $0x518] sm:$0xff] }
 0x856   :  { %v2938_v53 = vpack.c.bf16 %v1566_v52, %v1565_v51  ;;  %v1758_v51 = vld [vmem:[#allocation2 + $0x520] sm:$0xff]  ;;  %v1759_v52 = vld [vmem:[#allocation2 + $0x528] sm:$0xff] }
 0x857   :  { %2855 = vmatpush3.bf16.msra.mxu1 %v2854_v54  ;;  %v1567_v54 = vld [vmem:[#allocation2 + $0x410] sm:$0xff] }
 0x858   :  { %2856 = vmatprep.subr.bf16.mxu1 %v3076_v36 }
 0x85a   :  { %2440 = vmatmul.mubr.msk.f32.vlgmr.msra.gmra.mrb[6].mxu1 %vm242_vm5, %v1219_v58  ;;  %v1568_v58 = vld [vmem:[#allocation2 + $0x418] sm:$0xff] }
 0x85b   :  { %2858 = vmatpush3.bf16.msra.mxu1 %v2857_v55  ;;  %2474 = vmatprep.mubr.msk.f32.mxu1 %vm3077_vm4, %v3078_v37  ;;  %v2941_v55 = vpack.c.bf16 %v1568_v58, %v1567_v54  ;;  %v1760_v54 = vld [vmem:[#allocation2 + $0x530] sm:$0xff]  ;;  %v1761_v58 = vld [vmem:[#allocation2 + $0x538] sm:$0xff] }
 0x85c   :  { %2859 = vmatprep.subr.bf16.mxu1 %v3076_v36 }
 0x85f   :  { %2861 = vmatpush3.bf16.msra.mxu1 %v2860_v59  ;;  %v2944_v59 = vpack.c.bf16 %v1570_v57, %v1569_v56  ;;  %v1762_v56 = vld [vmem:[#allocation2 + $0x540] sm:$0xff]  ;;  %v1763_v57 = vld [vmem:[#allocation2 + $0x548] sm:$0xff] }
 0x860   :  { %2862 = vmatprep.subr.bf16.mxu1 %v3076_v36 }
 0x863   :  { %2864 = vmatpush3.bf16.msra.mxu1 %v2863_v62  ;;  %v2947_v62 = vpack.c.bf16 %v1572_v61, %v1571_v60  ;;  %v1665_v60 = vld [vmem:[#allocation2 + $0x4c0] sm:$0xff]  ;;  %v1666_v61 = vld [vmem:[#allocation2 + $0x4c8] sm:$0xff] }
 0x864   :  { %2865 = vmatprep.subr.bf16.mxu1 %v3076_v36 }
 0x867   :  { %2867 = vmatpush3.bf16.msra.mxu1 %v2866_v1 }
 0x868   :  { %2868 = vmatprep.subr.bf16.mxu1 %v3076_v36 }
 0x86b   :  { %2870 = vmatpush3.bf16.msra.mxu1 %v2869_v4  ;;  %v1573_v4 = vld [vmem:[#allocation2 + $0x440] sm:$0xff] }
 0x86c   :  { %2871 = vmatprep.subr.bf16.mxu1 %v3076_v36  ;;  %v2950_v6 = vpack.c.bf16 %v1574_v5, %v1573_v4 }
 0x86f   :  { %2873 = vmatpush3.bf16.msra.mxu1 %v2872_v7  ;;  %v3259_v10 = vpop.f32.mrb[20].mxu0  ;;  %v1651_v7 = vld [vmem:[#allocation2 + $0x450] sm:$0xff] }
 0x870   :  { %v2511_v12 = vpop.f32.mrb[21].mxu0  ;;  %2874 = vmatprep.subr.bf16.mxu1 %v3076_v36 }
 0x871   :  { %v1654_v12 = vld [vmem:[#allocation2 + $0x468] sm:$0xff] }
 0x872   :  { %v2956_v13 = vpack.c.bf16 %v1654_v12, %v1653_v9  ;;  %v1845_v12 = vld [vmem:[#allocation2 + $0x578] sm:$0xff] }
 0x873   :  { %2876 = vmatpush3.bf16.msra.mxu1 %v2875_v11  ;;  %v2953_v11 = vpack.c.bf16 %v1652_v8, %v1651_v7  ;;  %v1842_v7 = vld [vmem:[#allocation2 + $0x560] sm:$0xff]  ;;  %v1843_v8 = vld [vmem:[#allocation2 + $0x568] sm:$0xff] }
 0x874   :  { %2877 = vmatprep.subr.bf16.mxu1 %v3076_v36  ;;  %v3004_v9 = vpack.c.bf16 %v1843_v8, %v1842_v7 }
 0x877   :  { %2879 = vmatpush3.bf16.msra.mxu1 %v2878_v15  ;;  %v1656_v15 = vld [vmem:[#allocation2 + $0x478] sm:$0xff] }
 0x878   :  { %2904 = vmatprep.subr.bf16.mxu1 %v3076_v36 }
 0x87a   :  { %2475 = vmatmul.mubr.f32.vlgmr.msra.gmra.mrb[8].mxu1 %v1020_v43  ;;  %v1560_v43 = vld [vmem:[#allocation2 + $0x3d8] sm:$0xff] }
 0x87b   :  { %2906 = vmatpush3.bf16.msra.mxu1 %v2905_v18  ;;  %2544 = vmatprep.mubr.msk.f32.mxu1 %vm3077_vm4, %v3078_v37  ;;  %v2929_v45 = vpack.c.bf16 %v1560_v43, %v1559_v42  ;;  %v2962_v18 = vpack.c.bf16 %v1658_v17, %v1657_v16  ;;  %v1752_v42 = vld [vmem:[#allocation2 + $0x4f0] sm:$0xff]  ;;  %v1753_v43 = vld [vmem:[#allocation2 + $0x4f8] sm:$0xff] }
 0x87c   :  { %2907 = vmatprep.subr.bf16.mxu1 %v3076_v36  ;;  %v2983_v44 = vpack.c.bf16 %v1753_v43, %v1752_v42  ;;  %v1848_v16 = vld [vmem:[#allocation2 + $0x590] sm:$0xff]  ;;  %v1849_v17 = vld [vmem:[#allocation2 + $0x598] sm:$0xff]  ;;  %v3079_v42 = vmov 0  }
 0x87d   :  { %2930 = vmatpush3.bf16.msra.mxu0 %v2929_v45  ;;  %v1754_v45 = vld [vmem:[#allocation2 + $0x500] sm:$0xff] }
 0x87e   :  { %2931 = vmatprep.subr.bf16.mxu0 %v3076_v36 }
 0x87f   :  { %2909 = vmatpush3.bf16.msra.mxu1 %v2908_v21  ;;  %v2965_v21 = vpack.c.bf16 %v1660_v20, %v1659_v19  ;;  %v1851_v19 = vld [vmem:[#allocation2 + $0x5a8] sm:$0xff] }
 0x880   :  { %2910 = vmatprep.subr.bf16.mxu1 %v3076_v36 }
 0x881   :  { %2933 = vmatpush3.bf16.msra.mxu0 %v2932_v47  ;;  %v2986_v47 = vpack.c.bf16 %v1755_v46, %v1754_v45 }
 0x882   :  { %2934 = vmatprep.subr.bf16.mxu0 %v3076_v36 }
 0x883   :  { %2912 = vmatpush3.bf16.msra.mxu1 %v2911_v24  ;;  %v2968_v24 = vpack.c.bf16 %v1662_v23, %v1661_v22  ;;  %v1853_v22 = vld [vmem:[#allocation2 + $0x5b8] sm:$0xff] }
 0x884   :  { %2913 = vmatprep.subr.bf16.mxu1 %v3076_v36 }
 0x885   :  { %2936 = vmatpush3.bf16.msra.mxu0 %v2935_v50  ;;  %v2989_v50 = vpack.c.bf16 %v1757_v49, %v1756_v48 }
 0x886   :  { %2937 = vmatprep.subr.bf16.mxu0 %v3076_v36 }
 0x887   :  { %2915 = vmatpush3.bf16.msra.mxu1 %v2914_v27  ;;  %v2971_v27 = vpack.c.bf16 %v1664_v26, %v1663_v25  ;;  %v1855_v25 = vld [vmem:[#allocation2 + $0x5c8] sm:$0xff] }
 0x888   :  { %2916 = vmatprep.subr.bf16.mxu1 %v3076_v36  ;;  %v2001_v26 = vld [vmem:[%s3350_s8 + $0xc] ss:$0 sm:$0xff] }
 0x889   :  { %2939 = vmatpush3.bf16.msra.mxu0 %v2938_v53  ;;  %v2992_v53 = vpack.c.bf16 %v1759_v52, %v1758_v51 }
 0x88a   :  { %2940 = vmatprep.subr.bf16.mxu0 %v3076_v36 }
 0x88b   :  { %2918 = vmatpush3.bf16.msra.mxu1 %v2917_v30 }
 0x88c   :  { %2919 = vmatprep.subr.bf16.mxu1 %v3076_v36 }
 0x88d   :  { %2942 = vmatpush3.bf16.msra.mxu0 %v2941_v55  ;;  %v2995_v55 = vpack.c.bf16 %v1761_v58, %v1760_v54 }
 0x88e   :  { %2943 = vmatprep.subr.bf16.mxu0 %v3076_v36 }
 0x88f   :  { %2921 = vmatpush3.bf16.msra.mxu1 %v2920_v33  ;;  %v1749_v33 = vld [vmem:[#allocation2 + $0x4d8] sm:$0xff] }
 0x890   :  { %2922 = vmatprep.subr.bf16.mxu1 %v3076_v36  ;;  %v2977_v35 = vpack.c.bf16 %v1749_v33, %v1748_v32  ;;  %v1934_v32 = vlaneseq }
 0x891   :  { %2945 = vmatpush3.bf16.msra.mxu0 %v2944_v59  ;;  %v2998_v59 = vpack.c.bf16 %v1763_v57, %v1762_v56 }
 0x892   :  { %2946 = vmatprep.subr.bf16.mxu0 %v3076_v36  ;;  %v1935_v33 = vshrl.u32 %v1934_v32, 7 }
 0x893   :  { %2924 = vmatpush3.bf16.msra.mxu1 %v2923_v38 }
 0x894   :  { %2925 = vmatprep.subr.bf16.mxu1 %v3076_v36 }
 0x895   :  { %2948 = vmatpush3.bf16.msra.mxu0 %v2947_v62  ;;  %v2974_v62 = vpack.c.bf16 %v1666_v61, %v1665_v60 }
 0x896   :  { %2949 = vmatprep.subr.bf16.mxu0 %v3076_v36 }
 0x897   :  { %2927 = vmatpush3.bf16.msra.mxu1 %v2926_v41  ;;  %v2980_v41 = vpack.c.bf16 %v1751_v40, %v1750_v39 }
 0x898   :  { %2952 = vmatprep.subr.bf16.mxu1 %v3076_v36 }
 0x899   :  { %2951 = vmatpush3.bf16.msra.mxu0 %v2950_v6 }
 0x89a   :  { %2976 = vmatprep.subr.bf16.mxu0 %v3076_v36 }
 0x92d   :  { %v1289_v63 = vpop.f32.mrb[6].mxu1 }
 0x92e   :  { %v2441_v0 = vpop.f32.mrb[7].mxu1  ;;  %2545 = vmatmul.mubr.f32.vlgmr.msra.gmra.mrb[10].mxu1 %v1289_v63  ;;  %v1999_v63 = vld [vmem:[%s3350_s8 + $0xa] ss:$0 sm:$0xff] }
 0x92f   :  { %2614 = vmatprep.mubr.msk.f32.mxu1 %vm3077_vm4, %v3078_v37  ;;  %2954 = vmatpush3.bf16.msra.mxu1 %v2953_v11  ;;  %v1840_v0 = vld [vmem:[#allocation2 + $0x550] sm:$0xff] }
 0x930   :  { %2955 = vmatprep.subr.bf16.mxu1 %v3076_v36  ;;  %v1844_v11 = vld [vmem:[#allocation2 + $0x570] sm:$0xff] }
 0x933   :  { %2957 = vmatpush3.bf16.msra.mxu1 %v2956_v13  ;;  %v3007_v13 = vpack.c.bf16 %v1845_v12, %v1844_v11 }
 0x934   :  { %2958 = vmatprep.subr.bf16.mxu1 %v3076_v36 }
 0x94d   :  { %v1391_v1 = vpop.f32.mrb[8].mxu1 }
 0x94e   :  { %v1462_v2 = vadd.f32 %v3259_v10, %v1391_v1  ;;  %v2476_v3 = vpop.f32.mrb[9].mxu1  ;;  %v2959_v10 = vpack.c.bf16 %v1656_v15, %v1655_v14  ;;  %v1841_v1 = vld [vmem:[#allocation2 + $0x558] sm:$0xff]  ;;  %v1846_v14 = vld [vmem:[#allocation2 + $0x580] sm:$0xff]  ;;  %v1847_v15 = vld [vmem:[#allocation2 + $0x588] sm:$0xff] }
 0x94f   :  { %v3001_v5 = vpack.c.bf16 %v1841_v1, %v1840_v0  ;;  %v2003_v0 = vld [vmem:[%s3350_s8 + $0xe] ss:$0 sm:$0xff] }
 0x950   :  { %2960 = vmatpush3.bf16.msra.mxu1 %v2959_v10  ;;  %v3010_v10 = vpack.c.bf16 %v1847_v15, %v1846_v14 }
 0x951   :  { %2961 = vmatprep.subr.bf16.mxu1 %v3076_v36 }
 0x954   :  { %2963 = vmatpush3.bf16.msra.mxu1 %v2962_v18  ;;  %v3013_v18 = vpack.c.bf16 %v1849_v17, %v1848_v16 }
 0x955   :  { %2964 = vmatprep.subr.bf16.mxu1 %v3076_v36 }
 0x958   :  { %2966 = vmatpush3.bf16.msra.mxu1 %v2965_v21  ;;  %v1852_v21 = vld [vmem:[#allocation2 + $0x5b0] sm:$0xff] }
 0x959   :  { %2967 = vmatprep.subr.bf16.mxu1 %v3076_v36  ;;  %v3019_v23 = vpack.c.bf16 %v1853_v22, %v1852_v21 }
 0x95c   :  { %2969 = vmatpush3.bf16.msra.mxu1 %v2968_v24  ;;  %v1854_v24 = vld [vmem:[#allocation2 + $0x5c0] sm:$0xff] }
 0x95d   :  { %2970 = vmatprep.subr.bf16.mxu1 %v3076_v36 }
 0x960   :  { %2972 = vmatpush3.bf16.msra.mxu1 %v2971_v27  ;;  %v3022_v27 = vpack.c.bf16 %v1855_v25, %v1854_v24 }
 0x961   :  { %2973 = vmatprep.subr.bf16.mxu1 %v3076_v36 }
 0x964   :  { %2975 = vmatpush3.bf16.msra.mxu1 %v2974_v62 }
 0x965   :  { %3000 = vmatprep.subr.bf16.mxu1 %v3076_v36 }
 0xa01   :  { %v1547_v28 = vpop.f32.mrb[10].mxu1 }
 0xa02   :  { %v1551_v30 = vadd.f32 %v1547_v28, %v1462_v2  ;;  %v2546_v31 = vpop.f32.mrb[11].mxu1 }
 0xa04   :  { %v1557_v34 = vadd.f32 %v1998_v29, %v1551_v30 }
 0xa06   :  { %v3295_v38 = vmax.f32 %v1557_v34, 0.0  ;;  %v1936_v34 = vsub.s32 0, %v1935_v33 }
 0xa08   :  { %2580 = vmatmul.mubr.f32.vlgmr.msra.gmra.mrb[22].mxu0 %v3295_v38 }
 0xa09   :  { %2978 = vmatpush3.bf16.msra.mxu0 %v2977_v35  ;;  %2649 = vmatprep.mubr.msk.f32.mxu0 %vm3077_vm4, %v3078_v37  ;;  %v1931_v35 = vld [vmem:[%s3350_s8 + $0xf] sm:$0x1] }
 0xa0a   :  { %2979 = vmatprep.subr.bf16.mxu0 %v3076_v36  ;;  %v1963_v39 = vrot.slane %v1931_v35, %v1936_v34  ;;  %vm1932_vm11 = vcmp.gt.f32.partialorder %v1931_v35, 0.0 }
 0xa0b   :  { %v1933_v43 = vsel %vm1932_vm11, 1, %v3079_v42 }
 0xa0d   :  { %2981 = vmatpush3.bf16.msra.mxu0 %v2980_v41 }
 0xa0e   :  { %2982 = vmatprep.subr.bf16.mxu0 %v3076_v36 }
 0xa11   :  { %2984 = vmatpush3.bf16.msra.mxu0 %v2983_v44  ;;  %v2002_v44 = vld [vmem:[%s3350_s8 + $0xd] ss:$0 sm:$0xff] }
 0xa12   :  { %2985 = vmatprep.subr.bf16.mxu0 %v3076_v36 }
 0xa15   :  { %2987 = vmatpush3.bf16.msra.mxu0 %v2986_v47 }
 0xa16   :  { %2988 = vmatprep.subr.bf16.mxu0 %v3076_v36 }
 0xa19   :  { %2990 = vmatpush3.bf16.msra.mxu0 %v2989_v50 }
 0xa1a   :  { %2991 = vmatprep.subr.bf16.mxu0 %v3076_v36 }
 0xa1d   :  { %2993 = vmatpush3.bf16.msra.mxu0 %v2992_v53 }
 0xa1e   :  { %2994 = vmatprep.subr.bf16.mxu0 %v3076_v36 }
 0xa21   :  { %2996 = vmatpush3.bf16.msra.mxu0 %v2995_v55  ;;  %v2000_v55 = vld [vmem:[%s3350_s8 + $0xb] ss:$0 sm:$0xff] }
 0xa22   :  { %2997 = vmatprep.subr.bf16.mxu0 %v3076_v36 }
 0xa25   :  { %2999 = vmatpush3.bf16.msra.mxu0 %v2998_v59 }
 0xa28   :  { %2650 = vmatmul.mubr.f32.vlgmr.msra.gmra.mrb[24].mxu0 %v3295_v38 }
 0xadb   :  { %v1646_v2 = vpop.f32.mrb[22].mxu0 }
 0xadc   :  { %v1647_v3 = vadd.f32 %v1999_v63, %v1646_v2  ;;  %v2581_v4 = vpop.f32.mrb[23].mxu0 }
 0xade   :  { %v1650_v6 = vmax.f32 %v1647_v3, 0.0 }
 0xae0   :  { %2615 = vmatmul.mubr.f32.vlgmr.msra.gmra.mrb[12].mxu1 %v1650_v6 }
 0xae1   :  { %3002 = vmatpush3.bf16.msra.mxu1 %v3001_v5  ;;  %2684 = vmatprep.mubr.msk.f32.mxu1 %vm3077_vm4, %v3078_v37  ;;  %v1850_v37 = vld [vmem:[#allocation2 + $0x5a0] sm:$0xff] }
 0xae2   :  { %3003 = vmatprep.subr.bf16.mxu1 %v3076_v36  ;;  %v3016_v20 = vpack.c.bf16 %v1851_v19, %v1850_v37 }
 0xae5   :  { %3005 = vmatpush3.bf16.msra.mxu1 %v3004_v9 }
 0xae6   :  { %3006 = vmatprep.subr.bf16.mxu1 %v3076_v36 }
 0xae9   :  { %3008 = vmatpush3.bf16.msra.mxu1 %v3007_v13 }
 0xaea   :  { %3009 = vmatprep.subr.bf16.mxu1 %v3076_v36 }
 0xaed   :  { %3011 = vmatpush3.bf16.msra.mxu1 %v3010_v10 }
 0xaee   :  { %3012 = vmatprep.subr.bf16.mxu1 %v3076_v36 }
 0xaf1   :  { %3014 = vmatpush3.bf16.msra.mxu1 %v3013_v18 }
 0xaf2   :  { %3015 = vmatprep.subr.bf16.mxu1 %v3076_v36 }
 0xaf5   :  { %3017 = vmatpush3.bf16.msra.mxu1 %v3016_v20 }
 0xaf6   :  { %3018 = vmatprep.subr.bf16.mxu1 %v3076_v36 }
 0xaf9   :  { %3020 = vmatpush3.bf16.msra.mxu1 %v3019_v23 }
 0xafa   :  { %3021 = vmatprep.subr.bf16.mxu1 %v3076_v36  ;;  %v1937_v36 = vrot.slane %v1933_v43, %v1936_v34 }
 0xafb   :  { %v1835_v28 = vpop.f32.mrb[24].mxu0 }
 0xafc   :  { %v1836_v29 = vadd.f32 %v2001_v26, %v1835_v28  ;;  %v2651_v30 = vpop.f32.mrb[25].mxu0  ;;  %vm1938_vm12 = vcmp.eq.s32.totalorder %v1937_v36, 1 }
 0xafd   :  { %3023 = vmatpush3.bf16.msra.mxu1 %v3022_v27 }
 0xafe   :  { %v1839_v31 = vmax.f32 %v1836_v29, 0.0 }
 0xb00   :  { %2685 = vmatmul.mubr.f32.vlgmr.msra.gmra.mrb[14].mxu1 %v1839_v31 }
 0xbb3   :  { %v1738_v40 = vpop.f32.mrb[12].mxu1 }
 0xbb4   :  { %v2616_v41 = vpop.f32.mrb[13].mxu1  ;;  %v1739_v56 = vadd.f32 %v2000_v55, %v1738_v40 }
 0xbb6   :  { %v1742_v57 = vsub.f32 0.0, %v1739_v56 }
 0xbb8   :  { %v1743_v59 = vmul.f32 1.442695, %v1742_v57 }
 0xbd3   :  { %v1927_v45 = vpop.f32.mrb[14].mxu1 }
 0xbd4   :  { %v1928_v46 = vadd.f32 %v2002_v44, %v1927_v45  ;;  %v2686_v47 = vpop.f32.mrb[15].mxu1 }
 0xbd6   :  { %v1939_v48 = vsel %vm1938_vm12, %v1928_v46, -inf }
 0xbd7   :  { %v1940_v49 = vsel %vm1040_vm8, %v1939_v48, -inf }
 0xbd8   :  { %1941 = vmax.xlane.f32.xlu0 %v1940_v49 }
 0xc65   :  { %v1942_v50 = vpop.xlane.xlu0 %1941 }
 0xc66   :  { %v1943_v51 = vsub.f32 %v1928_v46, %v1942_v50 }
 0xc68   :  { %v1944_v52 = vmul.f32 1.442695, %v1943_v51 }
 0xc6a   :  { %3040 = vpow2.f32 %v1944_v52 }
 0xc6b   :  { %3042 = vpow2.f32 %v1743_v59 }
 0xc74   :  { %v3041_v53 = vpop.eup %3040 }
 0xc75   :  { %v1946_v54 = vsel %vm1938_vm12, %v3041_v53, 0.0  ;;  %v3043_v60 = vpop.eup %3042 }
 0xc76   :  { %v1947_v58 = vsel %vm1040_vm8, %v1946_v54, 0.0  ;;  %v1745_v61 = vadd.f32 1.0, %v3043_v60 }
 0xc77   :  { %1948 = vadd.xlane.f32.xlu1 %v1947_v58 }
 0xc78   :  { %3044 = vrcp.f32 %v1745_v61 }
 0xc82   :  { %v3045_v63 = vpop.eup %3044 }
 0xc83   :  { %v1958_v2 = vmul.f32 %v3045_v63, %v2003_v0 }
 0xc85   :  { %v1959_v5 = vadd.f32 %v1958_v2, %v3295_v38 }
 0xd04   :  { %v1949_v62 = vpop.xlane.xlu1 %1948 }
 0xd05   :  { %3046 = vlog2.f32 %v1949_v62 }
 0xd0f   :  { %v3047_v1 = vpop.eup %3046 }
 0xd10   :  { %v1951_v3 = vmul.f32 0.6931472, %v3047_v1 }
 0xd12   :  { %v1952_v4 = vsub.f32 %v1943_v51, %v1951_v3 }
 0xd14   :  { %v1964_v6 = vmul.f32 %v1963_v39, %v1952_v4 }
 0xd16   :  { %v1965_v7 = vadd.f32 %v1964_v6, %v1959_v5 }
 0xd18   :  { %1966 = vst [vmem:[%s3351_s9] sm:$0x3] %v1965_v7 }
 0xd19   :  { %1971 = vsyncpa [#allocation3], 1 }

</bundles_post_ra>
